<compile_context>
chip_gen: v7x
topology: tpu7x:2x2x1
jax: 0.10.0
libtpu: 0.0.40
codegen_flags: <defaults>
</compile_context>

<pallas_src>
import functools

import jax
import jax.numpy as jnp
from jax.experimental import pallas as pl
from jax.experimental.pallas import tpu as pltpu


# ----------------------------- fused Pallas kernel ---------------------------

def _fused_kernel(pidx_ref,                          # SMEM scalar-prefetch, (L*Gp,) int32
                  a_ref, x_ref, p_ref,               # bf16: adjacency / features / pool
                  wfh_ref, whh4_ref, wih_ref, whh_ref,  # bf16 packed weights
                  bias_ref,                          # f32 (8, slab) bias / vector slab
                  o_ref,                             # f32 (Gp, 128) lane-dense output
                  ne_sc, px_sc,                      # f32 VMEM scratch
                  *, seq_len, g_pad, hidden):
    f32 = jnp.float32
    bf16 = jnp.bfloat16
    h = hidden

    a = a_ref[...]                                   # (N, N) row-normalized adjacency
    x = x_ref[...]                                   # (N, F)

    # static slices of packed weights (hoisted, read once)
    wl1 = wfh_ref[:, 0:h]
    wr1 = wfh_ref[:, h:2 * h]
    wl2 = whh4_ref[:, 0:h]
    wr2 = whh4_ref[:, h:2 * h]
    w1g = whh4_ref[:, 2 * h:3 * h]
    w1p = whh4_ref[:, 3 * h:4 * h]
    b1 = bias_ref[0:1, 0:h]
    b2 = bias_ref[1:2, 0:h]
    bl = bias_ref[2:3, 0:4 * h]
    mb1 = bias_ref[3:4, 0:h]
    w2 = bias_ref[4:5, 0:h]
    mb2 = bias_ref[5:6, 0:1]

    # ---- SAGEConv 1: relu((A @ X) @ Wl1 + X @ Wr1 + b1) ----
    agg1 = jnp.dot(a, x, preferred_element_type=f32)                      # (N, F)
    h1 = (jnp.dot(agg1.astype(bf16), wl1, preferred_element_type=f32)
          + jnp.dot(x, wr1, preferred_element_type=f32) + b1)
    h1 = jnp.maximum(h1, 0.0)
    h1b = h1.astype(bf16)

    # ---- SAGEConv 2 (no relu) ----
    agg2 = jnp.dot(a, h1b, preferred_element_type=f32)                    # (N, H)
    node_emb = (jnp.dot(agg2.astype(bf16), wl2, preferred_element_type=f32)
                + jnp.dot(h1b, wr2, preferred_element_type=f32) + b2)     # (N, H) f32

    # ---- global mean pool ----
    graph_emb = jnp.dot(p_ref[...], node_emb.astype(bf16),
                        preferred_element_type=f32)                        # (Gp, H)

    # ---- path gather (time-major) via scalar-prefetched indices ----
    ne_sc[...] = node_emb
    for r in range(seq_len * g_pad):                 # row r = t*Gp + g -> path[g, t]
        idx = pidx_ref[r]
        px_sc[r:r + 1, :] = ne_sc[pl.ds(idx, 1), :]
    path_x = px_sc[...]                                                   # (L*Gp, H)

    # ---- LSTM (gate order i,f,g,o); hoisted input projection, 4H-wide gate dots ----
    wih = wih_ref[...]
    whh = whh_ref[...]
    zin = jnp.dot(path_x.astype(bf16), wih, preferred_element_type=f32) + bl  # (L*Gp, 4H)

    hh = jnp.zeros((g_pad, h), f32)
    cc = jnp.zeros((g_pad, h), f32)
    for t in range(seq_len):                         # seq_len small & static -> unrolled
        lo = t * g_pad
        z = zin[lo:lo + g_pad, :] + jnp.dot(hh.astype(bf16), whh,
                                            preferred_element_type=f32)   # (Gp, 4H)
        i_g = jax.nn.sigmoid(z[:, 0:h])
        f_g = jax.nn.sigmoid(z[:, h:2 * h])
        g_g = jnp.tanh(z[:, 2 * h:3 * h])
        o_g = jax.nn.sigmoid(z[:, 3 * h:4 * h])
        cc = f_g * cc + i_g * g_g
        hh = o_g * jnp.tanh(cc)

    # ---- scorer MLP: Linear(2H->H) split into graph/path halves, ReLU, Linear(H->1) ----
    hid = (jnp.dot(graph_emb.astype(bf16), w1g, preferred_element_type=f32)
           + jnp.dot(hh.astype(bf16), w1p, preferred_element_type=f32) + mb1)
    hid = jnp.maximum(hid, 0.0)
    # H -> 1 projection as a VPU/XLU lane reduction (no 1-lane MXU matmul)
    score = jnp.sum(hid * w2, axis=-1, keepdims=True) + mb2               # (Gp, 1)
    o_ref[...] = jnp.broadcast_to(score, o_ref.shape)                     # lane-dense store


# ----------------------------- model wrapper ---------------------------------

def init_params(key, feat_dim, hidden_dim):
    ks = jax.random.split(key, 14)
    u = lambda k, shape, scale: jax.random.uniform(k, shape, jnp.float32, -scale, scale)
    f, h = feat_dim, hidden_dim
    return {
        # SAGEConv 1 (weights stored transposed: x @ W)
        "wl1": u(ks[0], (f, h), 1.0 / f ** 0.5),
        "wr1": u(ks[1], (f, h), 1.0 / f ** 0.5),
        "b1": u(ks[2], (1, h), 1.0 / f ** 0.5),
        # SAGEConv 2
        "wl2": u(ks[3], (h, h), 1.0 / h ** 0.5),
        "wr2": u(ks[4], (h, h), 1.0 / h ** 0.5),
        "b2": u(ks[5], (1, h), 1.0 / h ** 0.5),
        # LSTM (gate order i, f, g, o; b = b_ih + b_hh)
        "wih": u(ks[6], (h, 4 * h), 1.0 / h ** 0.5),
        "whh": u(ks[7], (h, 4 * h), 1.0 / h ** 0.5),
        "blstm": u(ks[8], (1, 4 * h), 1.0 / h ** 0.5),
        # scorer MLP: Linear(2H, H) split into graph / path halves, then Linear(H, 1)
        "w1g": u(ks[9], (h, h), 1.0 / (2 * h) ** 0.5),
        "w1p": u(ks[10], (h, h), 1.0 / (2 * h) ** 0.5),
        "mb1": u(ks[11], (1, h), 1.0 / (2 * h) ** 0.5),
        "w2": u(ks[12], (h, 1), 1.0 / h ** 0.5),
        "mb2": u(ks[13], (1, 1), 1.0 / h ** 0.5),
    }


def path_scorer_gnn(params, x, edge_index, batch, path_indices, num_graphs):
    n, f = x.shape
    h = params["wl1"].shape[1]
    seq_len = int(path_indices.shape[1])
    ng = int(num_graphs)
    g_pad = -(-ng // 8) * 8                     # pad graphs to a full sublane block
    bf16 = jnp.bfloat16

    src, dst = edge_index[0], edge_index[1]
    # dense, row-normalized adjacency (mean aggregation over incoming edges)
    adj = jnp.zeros((n, n), jnp.float32).at[dst, src].add(1.0)
    deg = jnp.sum(adj, axis=1, keepdims=True)
    a = adj / jnp.maximum(deg, 1.0)

    # graph mean-pool matrix (padded graph rows are all zero)
    graph_ids = jnp.arange(g_pad, dtype=batch.dtype)
    onehot = (batch[None, :] == graph_ids[:, None]).astype(jnp.float32)   # (Gp, N)
    counts = jnp.sum(onehot, axis=1, keepdims=True)
    p = onehot / jnp.maximum(counts, 1.0)

    # time-major flattened path indices: row (t*Gp + g) -> path_indices[g, t]
    pidx_tm = jnp.transpose(path_indices)                                  # (L, G)
    pidx_tm = jnp.pad(pidx_tm, ((0, 0), (0, g_pad - ng)))                  # (L, Gp)
    pidx = pidx_tm.reshape(-1).astype(jnp.int32)

    # packed bf16 weights (MXU-native operands; accumulate stays f32 in-kernel)
    w_fh = jnp.concatenate([params["wl1"], params["wr1"]], axis=1).astype(bf16)     # (F, 2H)
    w_hh4 = jnp.concatenate([params["wl2"], params["wr2"],
                             params["w1g"], params["w1p"]], axis=1).astype(bf16)    # (H, 4H)
    wih_b = params["wih"].astype(bf16)                                              # (H, 4H)
    whh_b = params["whh"].astype(bf16)                                              # (H, 4H)

    # one slab for all small biases / vectors (single DMA, one VMEM tile)
    slab_w = max(128, 4 * h)
    bias = jnp.zeros((8, slab_w), jnp.float32)
    bias = bias.at[0, :h].set(params["b1"][0])
    bias = bias.at[1, :h].set(params["b2"][0])
    bias = bias.at[2, :4 * h].set(params["blstm"][0])
    bias = bias.at[3, :h].set(params["mb1"][0])
    bias = bias.at[4, :h].set(params["w2"][:, 0])
    bias = bias.at[5, :].set(params["mb2"][0, 0])

    kernel = functools.partial(_fused_kernel, seq_len=seq_len, g_pad=g_pad, hidden=h)

    grid_spec = pltpu.PrefetchScalarGridSpec(
        num_scalar_prefetch=1,
        grid=(1,),
        in_specs=[
            pl.BlockSpec((n, n), lambda i, s: (0, 0)),          # a
            pl.BlockSpec((n, f), lambda i, s: (0, 0)),          # x
            pl.BlockSpec((g_pad, n), lambda i, s: (0, 0)),      # pool matrix
            pl.BlockSpec((f, 2 * h), lambda i, s: (0, 0)),      # [wl1|wr1]
            pl.BlockSpec((h, 4 * h), lambda i, s: (0, 0)),      # [wl2|wr2|w1g|w1p]
            pl.BlockSpec((h, 4 * h), lambda i, s: (0, 0)),      # wih
            pl.BlockSpec((h, 4 * h), lambda i, s: (0, 0)),      # whh
            pl.BlockSpec((8, slab_w), lambda i, s: (0, 0)),     # bias slab
        ],
        out_specs=pl.BlockSpec((g_pad, 128), lambda i, s: (0, 0)),
        scratch_shapes=[
            pltpu.VMEM((n, h), jnp.float32),                    # node_emb copy for gather
            pltpu.VMEM((seq_len * g_pad, h), jnp.float32),      # gathered path inputs
        ],
    )

    out = pl.pallas_call(
        kernel,
        grid_spec=grid_spec,
        out_shape=jax.ShapeDtypeStruct((g_pad, 128), jnp.float32),
        compiler_params=pltpu.CompilerParams(
            dimension_semantics=("arbitrary",),
            vmem_limit_bytes=48 * 1024 * 1024,   # headroom for larger N; < v7x 64 MiB physical
        ),
    )(pidx, a.astype(bf16), x.astype(bf16), p.astype(bf16),
      w_fh, w_hh4, wih_b, whh_b, bias)

    return out[:ng, 0]                           # == torch.cat(path_scores)


# ----------------------------- pure-JAX reference ----------------------------

def reference(params, x, edge_index, batch, path_indices, num_graphs):
    n = x.shape[0]
    src, dst = edge_index[0], edge_index[1]
    adj = jnp.zeros((n, n), jnp.float32).at[dst, src].add(1.0)
    a = adj / jnp.maximum(jnp.sum(adj, axis=1, keepdims=True), 1.0)
    h1 = jnp.maximum(a @ x @ params["wl1"] + params["b1"] + x @ params["wr1"], 0.0)
    ne = a @ h1 @ params["wl2"] + params["b2"] + h1 @ params["wr2"]
    onehot = (batch[None, :] == jnp.arange(num_graphs)[:, None]).astype(jnp.float32)
    ge = (onehot / jnp.maximum(onehot.sum(1, keepdims=True), 1.0)) @ ne
    hdim = params["wih"].shape[0]
    px = ne[path_indices]                                    # (G, L, H)
    h = jnp.zeros((px.shape[0], hdim)); c = jnp.zeros_like(h)
    for t in range(px.shape[1]):
        z = px[:, t] @ params["wih"] + h @ params["whh"] + params["blstm"]
        i = jax.nn.sigmoid(z[:, :hdim]); f = jax.nn.sigmoid(z[:, hdim:2 * hdim])
        g = jnp.tanh(z[:, 2 * hdim:3 * hdim]); o = jax.nn.sigmoid(z[:, 3 * hdim:])
        c = f * c + i * g; h = o * jnp.tanh(c)
    hid = jnp.maximum(ge @ params["w1g"] + h @ params["w1p"] + params["mb1"], 0.0)
    return (hid @ params["w2"] + params["mb2"]).reshape(-1)


# ----------------------------------- main ------------------------------------

if __name__ == "__main__":
    FEAT_DIM = 8
    HIDDEN_DIM = 32
    NUM_GRAPHS = 2
    NODES_PER_GRAPH = 8
    N_NODES = NUM_GRAPHS * NODES_PER_GRAPH
    PATH_LEN = 4

    key = jax.random.PRNGKey(0)
    k_params, k_x = jax.random.split(key)
    params = init_params(k_params, FEAT_DIM, HIDDEN_DIM)

    x = jax.random.normal(k_x, (N_NODES, FEAT_DIM), jnp.float32)

    # deterministic ring edges (bidirectional) inside each graph
    src_list, dst_list = [], []
    for g in range(NUM_GRAPHS):
        base = g * NODES_PER_GRAPH
        for i in range(NODES_PER_GRAPH):
            a_, b_ = base + i, base + (i + 1) % NODES_PER_GRAPH
            src_list += [a_, b_]
            dst_list += [b_, a_]
    edge_index = jnp.array([src_list, dst_list], dtype=jnp.int32)

    batch = jnp.repeat(jnp.arange(NUM_GRAPHS, dtype=jnp.int32), NODES_PER_GRAPH)
    path_indices = jnp.array(
        [[g * NODES_PER_GRAPH + i for i in range(PATH_LEN)] for g in range(NUM_GRAPHS)],
        dtype=jnp.int32,
    )

    scores = path_scorer_gnn(params, x, edge_index, batch, path_indices, NUM_GRAPHS)
    scores = jax.block_until_ready(scores)

    ref = reference(params, x, edge_index, batch, path_indices, NUM_GRAPHS)
    assert scores.shape == (NUM_GRAPHS,)
    # bf16 MXU operands (native TPU matmul dtype) vs. the f32 reference: allow ~% level error
    assert jnp.allclose(scores, ref, rtol=5e-2, atol=5e-2), (scores, ref)

    print("KERNEL_OK")
</pallas_src>

<mosaic_0001>
module attributes {stable_mosaic.version = 11 : i64} {
  func.func @_fused_kernel(%arg0: i32, %arg1: memref<32xi32, #tpu.memory_space<smem>>, %arg2: memref<16x16xbf16, #tpu.memory_space<vmem>>, %arg3: memref<16x8xbf16, #tpu.memory_space<vmem>>, %arg4: memref<8x16xbf16, #tpu.memory_space<vmem>>, %arg5: memref<8x64xbf16, #tpu.memory_space<vmem>>, %arg6: memref<32x128xbf16, #tpu.memory_space<vmem>>, %arg7: memref<32x128xbf16, #tpu.memory_space<vmem>>, %arg8: memref<32x128xbf16, #tpu.memory_space<vmem>>, %arg9: memref<8x128xf32, #tpu.memory_space<vmem>>, %arg10: memref<8x128xf32, #tpu.memory_space<vmem>>, %arg11: memref<16x32xf32, #tpu.memory_space<vmem>>, %arg12: memref<32x32xf32, #tpu.memory_space<vmem>>) attributes {dimension_semantics = [#tpu.dimension_semantics<arbitrary>], iteration_bounds = array<i64: 1>, scalar_prefetch = 1 : i64, scratch_operands = 2 : i64, tpu.core_type = #tpu.core_type<tc>, window_params = [{pipeline_mode = #tpu.pipeline_mode<synchronous>, transform_indices = @transform_0, window_bounds = array<i64: 16, 16>}, {pipeline_mode = #tpu.pipeline_mode<synchronous>, transform_indices = @transform_1, window_bounds = array<i64: 16, 8>}, {pipeline_mode = #tpu.pipeline_mode<synchronous>, transform_indices = @transform_2, window_bounds = array<i64: 8, 16>}, {pipeline_mode = #tpu.pipeline_mode<synchronous>, transform_indices = @transform_3, window_bounds = array<i64: 8, 64>}, {pipeline_mode = #tpu.pipeline_mode<synchronous>, transform_indices = @transform_4, window_bounds = array<i64: 32, 128>}, {pipeline_mode = #tpu.pipeline_mode<synchronous>, transform_indices = @transform_5, window_bounds = array<i64: 32, 128>}, {pipeline_mode = #tpu.pipeline_mode<synchronous>, transform_indices = @transform_6, window_bounds = array<i64: 32, 128>}, {pipeline_mode = #tpu.pipeline_mode<synchronous>, transform_indices = @transform_7, window_bounds = array<i64: 8, 128>}, {pipeline_mode = #tpu.pipeline_mode<synchronous>, transform_indices = @transform_8, window_bounds = array<i64: 8, 128>}]} {
    %c0 = arith.constant 0 : index
    %c0_0 = arith.constant 0 : index
    %0 = vector.load %arg2[%c0, %c0_0] : memref<16x16xbf16, #tpu.memory_space<vmem>>, vector<16x16xbf16>
    %c0_1 = arith.constant 0 : index
    %c0_2 = arith.constant 0 : index
    %1 = vector.load %arg3[%c0_1, %c0_2] : memref<16x8xbf16, #tpu.memory_space<vmem>>, vector<16x8xbf16>
    %c0_3 = arith.constant 0 : index
    %c0_4 = arith.constant 0 : index
    %2 = vector.load %arg5[%c0_3, %c0_4] : memref<8x64xbf16, #tpu.memory_space<vmem>>, vector<8x32xbf16>
    %c0_5 = arith.constant 0 : index
    %c32 = arith.constant 32 : index
    %3 = vector.load %arg5[%c0_5, %c32] : memref<8x64xbf16, #tpu.memory_space<vmem>>, vector<8x32xbf16>
    %c0_6 = arith.constant 0 : index
    %c0_7 = arith.constant 0 : index
    %4 = vector.load %arg6[%c0_6, %c0_7] : memref<32x128xbf16, #tpu.memory_space<vmem>>, vector<32x32xbf16>
    %c0_8 = arith.constant 0 : index
    %c32_9 = arith.constant 32 : index
    %5 = vector.load %arg6[%c0_8, %c32_9] : memref<32x128xbf16, #tpu.memory_space<vmem>>, vector<32x32xbf16>
    %c0_10 = arith.constant 0 : index
    %c64 = arith.constant 64 : index
    %6 = vector.load %arg6[%c0_10, %c64] : memref<32x128xbf16, #tpu.memory_space<vmem>>, vector<32x32xbf16>
    %c0_11 = arith.constant 0 : index
    %c96 = arith.constant 96 : index
    %7 = vector.load %arg6[%c0_11, %c96] : memref<32x128xbf16, #tpu.memory_space<vmem>>, vector<32x32xbf16>
    %c0_12 = arith.constant 0 : index
    %c0_13 = arith.constant 0 : index
    %8 = vector.load %arg9[%c0_12, %c0_13] : memref<8x128xf32, #tpu.memory_space<vmem>>, vector<1x32xf32>
    %c1 = arith.constant 1 : index
    %c0_14 = arith.constant 0 : index
    %9 = vector.load %arg9[%c1, %c0_14] : memref<8x128xf32, #tpu.memory_space<vmem>>, vector<1x32xf32>
    %c2 = arith.constant 2 : index
    %c0_15 = arith.constant 0 : index
    %10 = vector.load %arg9[%c2, %c0_15] : memref<8x128xf32, #tpu.memory_space<vmem>>, vector<1x128xf32>
    %c3 = arith.constant 3 : index
    %c0_16 = arith.constant 0 : index
    %11 = vector.load %arg9[%c3, %c0_16] : memref<8x128xf32, #tpu.memory_space<vmem>>, vector<1x32xf32>
    %c4 = arith.constant 4 : index
    %c0_17 = arith.constant 0 : index
    %12 = vector.load %arg9[%c4, %c0_17] : memref<8x128xf32, #tpu.memory_space<vmem>>, vector<1x32xf32>
    %c5 = arith.constant 5 : index
    %c0_18 = arith.constant 0 : index
    %13 = vector.load %arg9[%c5, %c0_18] : memref<8x128xf32, #tpu.memory_space<vmem>>, vector<1x1xf32>
    %cst = arith.constant dense<0.000000e+00> : vector<16x8xf32>
    %14 = tpu.matmul %0, %1, %cst {dimension_numbers = #tpu.dot_dimension_numbers<[1], [0], [0], [1], [0, 0, 1, 1], [], []>} : vector<16x16xbf16>, vector<16x8xbf16>, vector<16x8xf32> -> vector<16x8xf32>
    %15 = arith.truncf %14 : vector<16x8xf32> to vector<16x8xbf16>
    %cst_19 = arith.constant dense<0.000000e+00> : vector<16x32xf32>
    %16 = tpu.matmul %15, %2, %cst_19 {dimension_numbers = #tpu.dot_dimension_numbers<[1], [0], [0], [1], [0, 0, 1, 1], [], []>} : vector<16x8xbf16>, vector<8x32xbf16>, vector<16x32xf32> -> vector<16x32xf32>
    %cst_20 = arith.constant dense<0.000000e+00> : vector<16x32xf32>
    %17 = tpu.matmul %1, %3, %cst_20 {dimension_numbers = #tpu.dot_dimension_numbers<[1], [0], [0], [1], [0, 0, 1, 1], [], []>} : vector<16x8xbf16>, vector<8x32xbf16>, vector<16x32xf32> -> vector<16x32xf32>
    %18 = arith.addf %16, %17 : vector<16x32xf32>
    %19 = vector.broadcast %8 : vector<1x32xf32> to vector<16x32xf32>
    %20 = arith.addf %18, %19 : vector<16x32xf32>
    %cst_21 = arith.constant 0.000000e+00 : f32
    %21 = vector.broadcast %cst_21 : f32 to vector<16x32xf32>
    %22 = arith.maximumf %20, %21 : vector<16x32xf32>
    %23 = arith.truncf %22 : vector<16x32xf32> to vector<16x32xbf16>
    %cst_22 = arith.constant dense<0.000000e+00> : vector<16x32xf32>
    %24 = tpu.matmul %0, %23, %cst_22 {dimension_numbers = #tpu.dot_dimension_numbers<[1], [0], [0], [1], [0, 0, 1, 1], [], []>} : vector<16x16xbf16>, vector<16x32xbf16>, vector<16x32xf32> -> vector<16x32xf32>
    %25 = arith.truncf %24 : vector<16x32xf32> to vector<16x32xbf16>
    %cst_23 = arith.constant dense<0.000000e+00> : vector<16x32xf32>
    %26 = tpu.matmul %25, %4, %cst_23 {dimension_numbers = #tpu.dot_dimension_numbers<[1], [0], [0], [1], [0, 0, 1, 1], [], []>} : vector<16x32xbf16>, vector<32x32xbf16>, vector<16x32xf32> -> vector<16x32xf32>
    %cst_24 = arith.constant dense<0.000000e+00> : vector<16x32xf32>
    %27 = tpu.matmul %23, %5, %cst_24 {dimension_numbers = #tpu.dot_dimension_numbers<[1], [0], [0], [1], [0, 0, 1, 1], [], []>} : vector<16x32xbf16>, vector<32x32xbf16>, vector<16x32xf32> -> vector<16x32xf32>
    %28 = arith.addf %26, %27 : vector<16x32xf32>
    %29 = vector.broadcast %9 : vector<1x32xf32> to vector<16x32xf32>
    %30 = arith.addf %28, %29 : vector<16x32xf32>
    %c0_25 = arith.constant 0 : index
    %c0_26 = arith.constant 0 : index
    %31 = vector.load %arg4[%c0_25, %c0_26] : memref<8x16xbf16, #tpu.memory_space<vmem>>, vector<8x16xbf16>
    %32 = arith.truncf %30 : vector<16x32xf32> to vector<16x32xbf16>
    %cst_27 = arith.constant dense<0.000000e+00> : vector<8x32xf32>
    %33 = tpu.matmul %31, %32, %cst_27 {dimension_numbers = #tpu.dot_dimension_numbers<[1], [0], [0], [1], [0, 0, 1, 1], [], []>} : vector<8x16xbf16>, vector<16x32xbf16>, vector<8x32xf32> -> vector<8x32xf32>
    %c0_28 = arith.constant 0 : index
    %c0_29 = arith.constant 0 : index
    %34 = vector.load %arg11[%c0_28, %c0_29] : memref<16x32xf32, #tpu.memory_space<vmem>>, vector<16x32xf32>
    tpu.vector_store %arg11[%c0_28, %c0_29], %30 {strides = array<i32>} : memref<16x32xf32, #tpu.memory_space<vmem>>, vector<16x32xf32>,
    %c0_30 = arith.constant 0 : index
    %35 = memref.load %arg1[%c0_30] : memref<32xi32, #tpu.memory_space<smem>>
    %36 = arith.index_cast %35 : i32 to index
    %c0_31 = arith.constant 0 : index
    %37 = vector.load %arg11[%36, %c0_31] : memref<16x32xf32, #tpu.memory_space<vmem>>, vector<1x32xf32>
    %c0_32 = arith.constant 0 : index
    %c0_33 = arith.constant 0 : index
    %38 = vector.load %arg12[%c0_32, %c0_33] : memref<32x32xf32, #tpu.memory_space<vmem>>, vector<1x32xf32>
    tpu.vector_store %arg12[%c0_32, %c0_33], %37 {strides = array<i32>} : memref<32x32xf32, #tpu.memory_space<vmem>>, vector<1x32xf32>,
    %c1_34 = arith.constant 1 : index
    %39 = memref.load %arg1[%c1_34] : memref<32xi32, #tpu.memory_space<smem>>
    %40 = arith.index_cast %39 : i32 to index
    %c0_35 = arith.constant 0 : index
    %41 = vector.load %arg11[%40, %c0_35] : memref<16x32xf32, #tpu.memory_space<vmem>>, vector<1x32xf32>
    %c1_36 = arith.constant 1 : index
    %c0_37 = arith.constant 0 : index
    %42 = vector.load %arg12[%c1_36, %c0_37] : memref<32x32xf32, #tpu.memory_space<vmem>>, vector<1x32xf32>
    tpu.vector_store %arg12[%c1_36, %c0_37], %41 {strides = array<i32>} : memref<32x32xf32, #tpu.memory_space<vmem>>, vector<1x32xf32>,
    %c2_38 = arith.constant 2 : index
    %43 = memref.load %arg1[%c2_38] : memref<32xi32, #tpu.memory_space<smem>>
    %44 = arith.index_cast %43 : i32 to index
    %c0_39 = arith.constant 0 : index
    %45 = vector.load %arg11[%44, %c0_39] : memref<16x32xf32, #tpu.memory_space<vmem>>, vector<1x32xf32>
    %c2_40 = arith.constant 2 : index
    %c0_41 = arith.constant 0 : index
    %46 = vector.load %arg12[%c2_40, %c0_41] : memref<32x32xf32, #tpu.memory_space<vmem>>, vector<1x32xf32>
    tpu.vector_store %arg12[%c2_40, %c0_41], %45 {strides = array<i32>} : memref<32x32xf32, #tpu.memory_space<vmem>>, vector<1x32xf32>,
    %c3_42 = arith.constant 3 : index
    %47 = memref.load %arg1[%c3_42] : memref<32xi32, #tpu.memory_space<smem>>
    %48 = arith.index_cast %47 : i32 to index
    %c0_43 = arith.constant 0 : index
    %49 = vector.load %arg11[%48, %c0_43] : memref<16x32xf32, #tpu.memory_space<vmem>>, vector<1x32xf32>
    %c3_44 = arith.constant 3 : index
    %c0_45 = arith.constant 0 : index
    %50 = vector.load %arg12[%c3_44, %c0_45] : memref<32x32xf32, #tpu.memory_space<vmem>>, vector<1x32xf32>
    tpu.vector_store %arg12[%c3_44, %c0_45], %49 {strides = array<i32>} : memref<32x32xf32, #tpu.memory_space<vmem>>, vector<1x32xf32>,
    %c4_46 = arith.constant 4 : index
    %51 = memref.load %arg1[%c4_46] : memref<32xi32, #tpu.memory_space<smem>>
    %52 = arith.index_cast %51 : i32 to index
    %c0_47 = arith.constant 0 : index
    %53 = vector.load %arg11[%52, %c0_47] : memref<16x32xf32, #tpu.memory_space<vmem>>, vector<1x32xf32>
    %c4_48 = arith.constant 4 : index
    %c0_49 = arith.constant 0 : index
    %54 = vector.load %arg12[%c4_48, %c0_49] : memref<32x32xf32, #tpu.memory_space<vmem>>, vector<1x32xf32>
    tpu.vector_store %arg12[%c4_48, %c0_49], %53 {strides = array<i32>} : memref<32x32xf32, #tpu.memory_space<vmem>>, vector<1x32xf32>,
    %c5_50 = arith.constant 5 : index
    %55 = memref.load %arg1[%c5_50] : memref<32xi32, #tpu.memory_space<smem>>
    %56 = arith.index_cast %55 : i32 to index
    %c0_51 = arith.constant 0 : index
    %57 = vector.load %arg11[%56, %c0_51] : memref<16x32xf32, #tpu.memory_space<vmem>>, vector<1x32xf32>
    %c5_52 = arith.constant 5 : index
    %c0_53 = arith.constant 0 : index
    %58 = vector.load %arg12[%c5_52, %c0_53] : memref<32x32xf32, #tpu.memory_space<vmem>>, vector<1x32xf32>
    tpu.vector_store %arg12[%c5_52, %c0_53], %57 {strides = array<i32>} : memref<32x32xf32, #tpu.memory_space<vmem>>, vector<1x32xf32>,
    %c6 = arith.constant 6 : index
    %59 = memref.load %arg1[%c6] : memref<32xi32, #tpu.memory_space<smem>>
    %60 = arith.index_cast %59 : i32 to index
    %c0_54 = arith.constant 0 : index
    %61 = vector.load %arg11[%60, %c0_54] : memref<16x32xf32, #tpu.memory_space<vmem>>, vector<1x32xf32>
    %c6_55 = arith.constant 6 : index
    %c0_56 = arith.constant 0 : index
    %62 = vector.load %arg12[%c6_55, %c0_56] : memref<32x32xf32, #tpu.memory_space<vmem>>, vector<1x32xf32>
    tpu.vector_store %arg12[%c6_55, %c0_56], %61 {strides = array<i32>} : memref<32x32xf32, #tpu.memory_space<vmem>>, vector<1x32xf32>,
    %c7 = arith.constant 7 : index
    %63 = memref.load %arg1[%c7] : memref<32xi32, #tpu.memory_space<smem>>
    %64 = arith.index_cast %63 : i32 to index
    %c0_57 = arith.constant 0 : index
    %65 = vector.load %arg11[%64, %c0_57] : memref<16x32xf32, #tpu.memory_space<vmem>>, vector<1x32xf32>
    %c7_58 = arith.constant 7 : index
    %c0_59 = arith.constant 0 : index
    %66 = vector.load %arg12[%c7_58, %c0_59] : memref<32x32xf32, #tpu.memory_space<vmem>>, vector<1x32xf32>
    tpu.vector_store %arg12[%c7_58, %c0_59], %65 {strides = array<i32>} : memref<32x32xf32, #tpu.memory_space<vmem>>, vector<1x32xf32>,
    %c8 = arith.constant 8 : index
    %67 = memref.load %arg1[%c8] : memref<32xi32, #tpu.memory_space<smem>>
    %68 = arith.index_cast %67 : i32 to index
    %c0_60 = arith.constant 0 : index
    %69 = vector.load %arg11[%68, %c0_60] : memref<16x32xf32, #tpu.memory_space<vmem>>, vector<1x32xf32>
    %c8_61 = arith.constant 8 : index
    %c0_62 = arith.constant 0 : index
    %70 = vector.load %arg12[%c8_61, %c0_62] : memref<32x32xf32, #tpu.memory_space<vmem>>, vector<1x32xf32>
    tpu.vector_store %arg12[%c8_61, %c0_62], %69 {strides = array<i32>} : memref<32x32xf32, #tpu.memory_space<vmem>>, vector<1x32xf32>,
    %c9 = arith.constant 9 : index
    %71 = memref.load %arg1[%c9] : memref<32xi32, #tpu.memory_space<smem>>
    %72 = arith.index_cast %71 : i32 to index
    %c0_63 = arith.constant 0 : index
    %73 = vector.load %arg11[%72, %c0_63] : memref<16x32xf32, #tpu.memory_space<vmem>>, vector<1x32xf32>
    %c9_64 = arith.constant 9 : index
    %c0_65 = arith.constant 0 : index
    %74 = vector.load %arg12[%c9_64, %c0_65] : memref<32x32xf32, #tpu.memory_space<vmem>>, vector<1x32xf32>
    tpu.vector_store %arg12[%c9_64, %c0_65], %73 {strides = array<i32>} : memref<32x32xf32, #tpu.memory_space<vmem>>, vector<1x32xf32>,
    %c10 = arith.constant 10 : index
    %75 = memref.load %arg1[%c10] : memref<32xi32, #tpu.memory_space<smem>>
    %76 = arith.index_cast %75 : i32 to index
    %c0_66 = arith.constant 0 : index
    %77 = vector.load %arg11[%76, %c0_66] : memref<16x32xf32, #tpu.memory_space<vmem>>, vector<1x32xf32>
    %c10_67 = arith.constant 10 : index
    %c0_68 = arith.constant 0 : index
    %78 = vector.load %arg12[%c10_67, %c0_68] : memref<32x32xf32, #tpu.memory_space<vmem>>, vector<1x32xf32>
    tpu.vector_store %arg12[%c10_67, %c0_68], %77 {strides = array<i32>} : memref<32x32xf32, #tpu.memory_space<vmem>>, vector<1x32xf32>,
    %c11 = arith.constant 11 : index
    %79 = memref.load %arg1[%c11] : memref<32xi32, #tpu.memory_space<smem>>
    %80 = arith.index_cast %79 : i32 to index
    %c0_69 = arith.constant 0 : index
    %81 = vector.load %arg11[%80, %c0_69] : memref<16x32xf32, #tpu.memory_space<vmem>>, vector<1x32xf32>
    %c11_70 = arith.constant 11 : index
    %c0_71 = arith.constant 0 : index
    %82 = vector.load %arg12[%c11_70, %c0_71] : memref<32x32xf32, #tpu.memory_space<vmem>>, vector<1x32xf32>
    tpu.vector_store %arg12[%c11_70, %c0_71], %81 {strides = array<i32>} : memref<32x32xf32, #tpu.memory_space<vmem>>, vector<1x32xf32>,
    %c12 = arith.constant 12 : index
    %83 = memref.load %arg1[%c12] : memref<32xi32, #tpu.memory_space<smem>>
    %84 = arith.index_cast %83 : i32 to index
    %c0_72 = arith.constant 0 : index
    %85 = vector.load %arg11[%84, %c0_72] : memref<16x32xf32, #tpu.memory_space<vmem>>, vector<1x32xf32>
    %c12_73 = arith.constant 12 : index
    %c0_74 = arith.constant 0 : index
    %86 = vector.load %arg12[%c12_73, %c0_74] : memref<32x32xf32, #tpu.memory_space<vmem>>, vector<1x32xf32>
    tpu.vector_store %arg12[%c12_73, %c0_74], %85 {strides = array<i32>} : memref<32x32xf32, #tpu.memory_space<vmem>>, vector<1x32xf32>,
    %c13 = arith.constant 13 : index
    %87 = memref.load %arg1[%c13] : memref<32xi32, #tpu.memory_space<smem>>
    %88 = arith.index_cast %87 : i32 to index
    %c0_75 = arith.constant 0 : index
    %89 = vector.load %arg11[%88, %c0_75] : memref<16x32xf32, #tpu.memory_space<vmem>>, vector<1x32xf32>
    %c13_76 = arith.constant 13 : index
    %c0_77 = arith.constant 0 : index
    %90 = vector.load %arg12[%c13_76, %c0_77] : memref<32x32xf32, #tpu.memory_space<vmem>>, vector<1x32xf32>
    tpu.vector_store %arg12[%c13_76, %c0_77], %89 {strides = array<i32>} : memref<32x32xf32, #tpu.memory_space<vmem>>, vector<1x32xf32>,
    %c14 = arith.constant 14 : index
    %91 = memref.load %arg1[%c14] : memref<32xi32, #tpu.memory_space<smem>>
    %92 = arith.index_cast %91 : i32 to index
    %c0_78 = arith.constant 0 : index
    %93 = vector.load %arg11[%92, %c0_78] : memref<16x32xf32, #tpu.memory_space<vmem>>, vector<1x32xf32>
    %c14_79 = arith.constant 14 : index
    %c0_80 = arith.constant 0 : index
    %94 = vector.load %arg12[%c14_79, %c0_80] : memref<32x32xf32, #tpu.memory_space<vmem>>, vector<1x32xf32>
    tpu.vector_store %arg12[%c14_79, %c0_80], %93 {strides = array<i32>} : memref<32x32xf32, #tpu.memory_space<vmem>>, vector<1x32xf32>,
    %c15 = arith.constant 15 : index
    %95 = memref.load %arg1[%c15] : memref<32xi32, #tpu.memory_space<smem>>
    %96 = arith.index_cast %95 : i32 to index
    %c0_81 = arith.constant 0 : index
    %97 = vector.load %arg11[%96, %c0_81] : memref<16x32xf32, #tpu.memory_space<vmem>>, vector<1x32xf32>
    %c15_82 = arith.constant 15 : index
    %c0_83 = arith.constant 0 : index
    %98 = vector.load %arg12[%c15_82, %c0_83] : memref<32x32xf32, #tpu.memory_space<vmem>>, vector<1x32xf32>
    tpu.vector_store %arg12[%c15_82, %c0_83], %97 {strides = array<i32>} : memref<32x32xf32, #tpu.memory_space<vmem>>, vector<1x32xf32>,
    %c16 = arith.constant 16 : index
    %99 = memref.load %arg1[%c16] : memref<32xi32, #tpu.memory_space<smem>>
    %100 = arith.index_cast %99 : i32 to index
    %c0_84 = arith.constant 0 : index
    %101 = vector.load %arg11[%100, %c0_84] : memref<16x32xf32, #tpu.memory_space<vmem>>, vector<1x32xf32>
    %c16_85 = arith.constant 16 : index
    %c0_86 = arith.constant 0 : index
    %102 = vector.load %arg12[%c16_85, %c0_86] : memref<32x32xf32, #tpu.memory_space<vmem>>, vector<1x32xf32>
    tpu.vector_store %arg12[%c16_85, %c0_86], %101 {strides = array<i32>} : memref<32x32xf32, #tpu.memory_space<vmem>>, vector<1x32xf32>,
    %c17 = arith.constant 17 : index
    %103 = memref.load %arg1[%c17] : memref<32xi32, #tpu.memory_space<smem>>
    %104 = arith.index_cast %103 : i32 to index
    %c0_87 = arith.constant 0 : index
    %105 = vector.load %arg11[%104, %c0_87] : memref<16x32xf32, #tpu.memory_space<vmem>>, vector<1x32xf32>
    %c17_88 = arith.constant 17 : index
    %c0_89 = arith.constant 0 : index
    %106 = vector.load %arg12[%c17_88, %c0_89] : memref<32x32xf32, #tpu.memory_space<vmem>>, vector<1x32xf32>
    tpu.vector_store %arg12[%c17_88, %c0_89], %105 {strides = array<i32>} : memref<32x32xf32, #tpu.memory_space<vmem>>, vector<1x32xf32>,
    %c18 = arith.constant 18 : index
    %107 = memref.load %arg1[%c18] : memref<32xi32, #tpu.memory_space<smem>>
    %108 = arith.index_cast %107 : i32 to index
    %c0_90 = arith.constant 0 : index
    %109 = vector.load %arg11[%108, %c0_90] : memref<16x32xf32, #tpu.memory_space<vmem>>, vector<1x32xf32>
    %c18_91 = arith.constant 18 : index
    %c0_92 = arith.constant 0 : index
    %110 = vector.load %arg12[%c18_91, %c0_92] : memref<32x32xf32, #tpu.memory_space<vmem>>, vector<1x32xf32>
    tpu.vector_store %arg12[%c18_91, %c0_92], %109 {strides = array<i32>} : memref<32x32xf32, #tpu.memory_space<vmem>>, vector<1x32xf32>,
    %c19 = arith.constant 19 : index
    %111 = memref.load %arg1[%c19] : memref<32xi32, #tpu.memory_space<smem>>
    %112 = arith.index_cast %111 : i32 to index
    %c0_93 = arith.constant 0 : index
    %113 = vector.load %arg11[%112, %c0_93] : memref<16x32xf32, #tpu.memory_space<vmem>>, vector<1x32xf32>
    %c19_94 = arith.constant 19 : index
    %c0_95 = arith.constant 0 : index
    %114 = vector.load %arg12[%c19_94, %c0_95] : memref<32x32xf32, #tpu.memory_space<vmem>>, vector<1x32xf32>
    tpu.vector_store %arg12[%c19_94, %c0_95], %113 {strides = array<i32>} : memref<32x32xf32, #tpu.memory_space<vmem>>, vector<1x32xf32>,
    %c20 = arith.constant 20 : index
    %115 = memref.load %arg1[%c20] : memref<32xi32, #tpu.memory_space<smem>>
    %116 = arith.index_cast %115 : i32 to index
    %c0_96 = arith.constant 0 : index
    %117 = vector.load %arg11[%116, %c0_96] : memref<16x32xf32, #tpu.memory_space<vmem>>, vector<1x32xf32>
    %c20_97 = arith.constant 20 : index
    %c0_98 = arith.constant 0 : index
    %118 = vector.load %arg12[%c20_97, %c0_98] : memref<32x32xf32, #tpu.memory_space<vmem>>, vector<1x32xf32>
    tpu.vector_store %arg12[%c20_97, %c0_98], %117 {strides = array<i32>} : memref<32x32xf32, #tpu.memory_space<vmem>>, vector<1x32xf32>,
    %c21 = arith.constant 21 : index
    %119 = memref.load %arg1[%c21] : memref<32xi32, #tpu.memory_space<smem>>
    %120 = arith.index_cast %119 : i32 to index
    %c0_99 = arith.constant 0 : index
    %121 = vector.load %arg11[%120, %c0_99] : memref<16x32xf32, #tpu.memory_space<vmem>>, vector<1x32xf32>
    %c21_100 = arith.constant 21 : index
    %c0_101 = arith.constant 0 : index
    %122 = vector.load %arg12[%c21_100, %c0_101] : memref<32x32xf32, #tpu.memory_space<vmem>>, vector<1x32xf32>
    tpu.vector_store %arg12[%c21_100, %c0_101], %121 {strides = array<i32>} : memref<32x32xf32, #tpu.memory_space<vmem>>, vector<1x32xf32>,
    %c22 = arith.constant 22 : index
    %123 = memref.load %arg1[%c22] : memref<32xi32, #tpu.memory_space<smem>>
    %124 = arith.index_cast %123 : i32 to index
    %c0_102 = arith.constant 0 : index
    %125 = vector.load %arg11[%124, %c0_102] : memref<16x32xf32, #tpu.memory_space<vmem>>, vector<1x32xf32>
    %c22_103 = arith.constant 22 : index
    %c0_104 = arith.constant 0 : index
    %126 = vector.load %arg12[%c22_103, %c0_104] : memref<32x32xf32, #tpu.memory_space<vmem>>, vector<1x32xf32>
    tpu.vector_store %arg12[%c22_103, %c0_104], %125 {strides = array<i32>} : memref<32x32xf32, #tpu.memory_space<vmem>>, vector<1x32xf32>,
    %c23 = arith.constant 23 : index
    %127 = memref.load %arg1[%c23] : memref<32xi32, #tpu.memory_space<smem>>
    %128 = arith.index_cast %127 : i32 to index
    %c0_105 = arith.constant 0 : index
    %129 = vector.load %arg11[%128, %c0_105] : memref<16x32xf32, #tpu.memory_space<vmem>>, vector<1x32xf32>
    %c23_106 = arith.constant 23 : index
    %c0_107 = arith.constant 0 : index
    %130 = vector.load %arg12[%c23_106, %c0_107] : memref<32x32xf32, #tpu.memory_space<vmem>>, vector<1x32xf32>
    tpu.vector_store %arg12[%c23_106, %c0_107], %129 {strides = array<i32>} : memref<32x32xf32, #tpu.memory_space<vmem>>, vector<1x32xf32>,
    %c24 = arith.constant 24 : index
    %131 = memref.load %arg1[%c24] : memref<32xi32, #tpu.memory_space<smem>>
    %132 = arith.index_cast %131 : i32 to index
    %c0_108 = arith.constant 0 : index
    %133 = vector.load %arg11[%132, %c0_108] : memref<16x32xf32, #tpu.memory_space<vmem>>, vector<1x32xf32>
    %c24_109 = arith.constant 24 : index
    %c0_110 = arith.constant 0 : index
    %134 = vector.load %arg12[%c24_109, %c0_110] : memref<32x32xf32, #tpu.memory_space<vmem>>, vector<1x32xf32>
    tpu.vector_store %arg12[%c24_109, %c0_110], %133 {strides = array<i32>} : memref<32x32xf32, #tpu.memory_space<vmem>>, vector<1x32xf32>,
    %c25 = arith.constant 25 : index
    %135 = memref.load %arg1[%c25] : memref<32xi32, #tpu.memory_space<smem>>
    %136 = arith.index_cast %135 : i32 to index
    %c0_111 = arith.constant 0 : index
    %137 = vector.load %arg11[%136, %c0_111] : memref<16x32xf32, #tpu.memory_space<vmem>>, vector<1x32xf32>
    %c25_112 = arith.constant 25 : index
    %c0_113 = arith.constant 0 : index
    %138 = vector.load %arg12[%c25_112, %c0_113] : memref<32x32xf32, #tpu.memory_space<vmem>>, vector<1x32xf32>
    tpu.vector_store %arg12[%c25_112, %c0_113], %137 {strides = array<i32>} : memref<32x32xf32, #tpu.memory_space<vmem>>, vector<1x32xf32>,
    %c26 = arith.constant 26 : index
    %139 = memref.load %arg1[%c26] : memref<32xi32, #tpu.memory_space<smem>>
    %140 = arith.index_cast %139 : i32 to index
    %c0_114 = arith.constant 0 : index
    %141 = vector.load %arg11[%140, %c0_114] : memref<16x32xf32, #tpu.memory_space<vmem>>, vector<1x32xf32>
    %c26_115 = arith.constant 26 : index
    %c0_116 = arith.constant 0 : index
    %142 = vector.load %arg12[%c26_115, %c0_116] : memref<32x32xf32, #tpu.memory_space<vmem>>, vector<1x32xf32>
    tpu.vector_store %arg12[%c26_115, %c0_116], %141 {strides = array<i32>} : memref<32x32xf32, #tpu.memory_space<vmem>>, vector<1x32xf32>,
    %c27 = arith.constant 27 : index
    %143 = memref.load %arg1[%c27] : memref<32xi32, #tpu.memory_space<smem>>
    %144 = arith.index_cast %143 : i32 to index
    %c0_117 = arith.constant 0 : index
    %145 = vector.load %arg11[%144, %c0_117] : memref<16x32xf32, #tpu.memory_space<vmem>>, vector<1x32xf32>
    %c27_118 = arith.constant 27 : index
    %c0_119 = arith.constant 0 : index
    %146 = vector.load %arg12[%c27_118, %c0_119] : memref<32x32xf32, #tpu.memory_space<vmem>>, vector<1x32xf32>
    tpu.vector_store %arg12[%c27_118, %c0_119], %145 {strides = array<i32>} : memref<32x32xf32, #tpu.memory_space<vmem>>, vector<1x32xf32>,
    %c28 = arith.constant 28 : index
    %147 = memref.load %arg1[%c28] : memref<32xi32, #tpu.memory_space<smem>>
    %148 = arith.index_cast %147 : i32 to index
    %c0_120 = arith.constant 0 : index
    %149 = vector.load %arg11[%148, %c0_120] : memref<16x32xf32, #tpu.memory_space<vmem>>, vector<1x32xf32>
    %c28_121 = arith.constant 28 : index
    %c0_122 = arith.constant 0 : index
    %150 = vector.load %arg12[%c28_121, %c0_122] : memref<32x32xf32, #tpu.memory_space<vmem>>, vector<1x32xf32>
    tpu.vector_store %arg12[%c28_121, %c0_122], %149 {strides = array<i32>} : memref<32x32xf32, #tpu.memory_space<vmem>>, vector<1x32xf32>,
    %c29 = arith.constant 29 : index
    %151 = memref.load %arg1[%c29] : memref<32xi32, #tpu.memory_space<smem>>
    %152 = arith.index_cast %151 : i32 to index
    %c0_123 = arith.constant 0 : index
    %153 = vector.load %arg11[%152, %c0_123] : memref<16x32xf32, #tpu.memory_space<vmem>>, vector<1x32xf32>
    %c29_124 = arith.constant 29 : index
    %c0_125 = arith.constant 0 : index
    %154 = vector.load %arg12[%c29_124, %c0_125] : memref<32x32xf32, #tpu.memory_space<vmem>>, vector<1x32xf32>
    tpu.vector_store %arg12[%c29_124, %c0_125], %153 {strides = array<i32>} : memref<32x32xf32, #tpu.memory_space<vmem>>, vector<1x32xf32>,
    %c30 = arith.constant 30 : index
    %155 = memref.load %arg1[%c30] : memref<32xi32, #tpu.memory_space<smem>>
    %156 = arith.index_cast %155 : i32 to index
    %c0_126 = arith.constant 0 : index
    %157 = vector.load %arg11[%156, %c0_126] : memref<16x32xf32, #tpu.memory_space<vmem>>, vector<1x32xf32>
    %c30_127 = arith.constant 30 : index
    %c0_128 = arith.constant 0 : index
    %158 = vector.load %arg12[%c30_127, %c0_128] : memref<32x32xf32, #tpu.memory_space<vmem>>, vector<1x32xf32>
    tpu.vector_store %arg12[%c30_127, %c0_128], %157 {strides = array<i32>} : memref<32x32xf32, #tpu.memory_space<vmem>>, vector<1x32xf32>,
    %c31 = arith.constant 31 : index
    %159 = memref.load %arg1[%c31] : memref<32xi32, #tpu.memory_space<smem>>
    %160 = arith.index_cast %159 : i32 to index
    %c0_129 = arith.constant 0 : index
    %161 = vector.load %arg11[%160, %c0_129] : memref<16x32xf32, #tpu.memory_space<vmem>>, vector<1x32xf32>
    %c31_130 = arith.constant 31 : index
    %c0_131 = arith.constant 0 : index
    %162 = vector.load %arg12[%c31_130, %c0_131] : memref<32x32xf32, #tpu.memory_space<vmem>>, vector<1x32xf32>
    tpu.vector_store %arg12[%c31_130, %c0_131], %161 {strides = array<i32>} : memref<32x32xf32, #tpu.memory_space<vmem>>, vector<1x32xf32>,
    %c0_132 = arith.constant 0 : index
    %c0_133 = arith.constant 0 : index
    %163 = vector.load %arg12[%c0_132, %c0_133] : memref<32x32xf32, #tpu.memory_space<vmem>>, vector<32x32xf32>
    %c0_134 = arith.constant 0 : index
    %c0_135 = arith.constant 0 : index
    %164 = vector.load %arg7[%c0_134, %c0_135] : memref<32x128xbf16, #tpu.memory_space<vmem>>, vector<32x128xbf16>
    %c0_136 = arith.constant 0 : index
    %c0_137 = arith.constant 0 : index
    %165 = vector.load %arg8[%c0_136, %c0_137] : memref<32x128xbf16, #tpu.memory_space<vmem>>, vector<32x128xbf16>
    %166 = arith.truncf %163 : vector<32x32xf32> to vector<32x32xbf16>
    %cst_138 = arith.constant dense<0.000000e+00> : vector<32x128xf32>
    %167 = tpu.matmul %166, %164, %cst_138 {dimension_numbers = #tpu.dot_dimension_numbers<[1], [0], [0], [1], [0, 0, 1, 1], [], []>} : vector<32x32xbf16>, vector<32x128xbf16>, vector<32x128xf32> -> vector<32x128xf32>
    %168 = vector.broadcast %10 : vector<1x128xf32> to vector<32x128xf32>
    %169 = arith.addf %167, %168 : vector<32x128xf32>
    %cst_139 = arith.constant 0.000000e+00 : f32
    %170 = vector.broadcast %cst_139 : f32 to vector<8x32xf32>
    %cst_140 = arith.constant 0.000000e+00 : f32
    %171 = vector.broadcast %cst_140 : f32 to vector<8x32xf32>
    %172 = vector.extract_strided_slice %169 {offsets = [0, 0], sizes = [8, 128], strides = [1, 1]} : vector<32x128xf32> to vector<8x128xf32>
    %173 = arith.truncf %170 : vector<8x32xf32> to vector<8x32xbf16>
    %cst_141 = arith.constant dense<0.000000e+00> : vector<8x128xf32>
    %174 = tpu.matmul %173, %165, %cst_141 {dimension_numbers = #tpu.dot_dimension_numbers<[1], [0], [0], [1], [0, 0, 1, 1], [], []>} : vector<8x32xbf16>, vector<32x128xbf16>, vector<8x128xf32> -> vector<8x128xf32>
    %175 = arith.addf %172, %174 : vector<8x128xf32>
    %176 = vector.extract_strided_slice %175 {offsets = [0, 0], sizes = [8, 32], strides = [1, 1]} : vector<8x128xf32> to vector<8x32xf32>
    %177 = arith.negf %176 : vector<8x32xf32>
    %178 = math.exp %177 : vector<8x32xf32>
    %cst_142 = arith.constant 1.000000e+00 : f32
    %179 = vector.broadcast %cst_142 : f32 to vector<8x32xf32>
    %180 = arith.addf %179, %178 : vector<8x32xf32>
    %181 = arith.divf %179, %180 : vector<8x32xf32>
    %182 = vector.extract_strided_slice %175 {offsets = [0, 32], sizes = [8, 32], strides = [1, 1]} : vector<8x128xf32> to vector<8x32xf32>
    %183 = arith.negf %182 : vector<8x32xf32>
    %184 = math.exp %183 : vector<8x32xf32>
    %cst_143 = arith.constant 1.000000e+00 : f32
    %185 = vector.broadcast %cst_143 : f32 to vector<8x32xf32>
    %186 = arith.addf %185, %184 : vector<8x32xf32>
    %187 = arith.divf %185, %186 : vector<8x32xf32>
    %188 = vector.extract_strided_slice %175 {offsets = [0, 64], sizes = [8, 32], strides = [1, 1]} : vector<8x128xf32> to vector<8x32xf32>
    %189 = math.tanh %188 : vector<8x32xf32>
    %190 = vector.extract_strided_slice %175 {offsets = [0, 96], sizes = [8, 32], strides = [1, 1]} : vector<8x128xf32> to vector<8x32xf32>
    %191 = arith.negf %190 : vector<8x32xf32>
    %192 = math.exp %191 : vector<8x32xf32>
    %cst_144 = arith.constant 1.000000e+00 : f32
    %193 = vector.broadcast %cst_144 : f32 to vector<8x32xf32>
    %194 = arith.addf %193, %192 : vector<8x32xf32>
    %195 = arith.divf %193, %194 : vector<8x32xf32>
    %196 = arith.mulf %187, %171 : vector<8x32xf32>
    %197 = arith.mulf %181, %189 : vector<8x32xf32>
    %198 = arith.addf %196, %197 : vector<8x32xf32>
    %199 = math.tanh %198 : vector<8x32xf32>
    %200 = arith.mulf %195, %199 : vector<8x32xf32>
    %201 = vector.extract_strided_slice %169 {offsets = [8, 0], sizes = [8, 128], strides = [1, 1]} : vector<32x128xf32> to vector<8x128xf32>
    %202 = arith.truncf %200 : vector<8x32xf32> to vector<8x32xbf16>
    %cst_145 = arith.constant dense<0.000000e+00> : vector<8x128xf32>
    %203 = tpu.matmul %202, %165, %cst_145 {dimension_numbers = #tpu.dot_dimension_numbers<[1], [0], [0], [1], [0, 0, 1, 1], [], []>} : vector<8x32xbf16>, vector<32x128xbf16>, vector<8x128xf32> -> vector<8x128xf32>
    %204 = arith.addf %201, %203 : vector<8x128xf32>
    %205 = vector.extract_strided_slice %204 {offsets = [0, 0], sizes = [8, 32], strides = [1, 1]} : vector<8x128xf32> to vector<8x32xf32>
    %206 = arith.negf %205 : vector<8x32xf32>
    %207 = math.exp %206 : vector<8x32xf32>
    %cst_146 = arith.constant 1.000000e+00 : f32
    %208 = vector.broadcast %cst_146 : f32 to vector<8x32xf32>
    %209 = arith.addf %208, %207 : vector<8x32xf32>
    %210 = arith.divf %208, %209 : vector<8x32xf32>
    %211 = vector.extract_strided_slice %204 {offsets = [0, 32], sizes = [8, 32], strides = [1, 1]} : vector<8x128xf32> to vector<8x32xf32>
    %212 = arith.negf %211 : vector<8x32xf32>
    %213 = math.exp %212 : vector<8x32xf32>
    %cst_147 = arith.constant 1.000000e+00 : f32
    %214 = vector.broadcast %cst_147 : f32 to vector<8x32xf32>
    %215 = arith.addf %214, %213 : vector<8x32xf32>
    %216 = arith.divf %214, %215 : vector<8x32xf32>
    %217 = vector.extract_strided_slice %204 {offsets = [0, 64], sizes = [8, 32], strides = [1, 1]} : vector<8x128xf32> to vector<8x32xf32>
    %218 = math.tanh %217 : vector<8x32xf32>
    %219 = vector.extract_strided_slice %204 {offsets = [0, 96], sizes = [8, 32], strides = [1, 1]} : vector<8x128xf32> to vector<8x32xf32>
    %220 = arith.negf %219 : vector<8x32xf32>
    %221 = math.exp %220 : vector<8x32xf32>
    %cst_148 = arith.constant 1.000000e+00 : f32
    %222 = vector.broadcast %cst_148 : f32 to vector<8x32xf32>
    %223 = arith.addf %222, %221 : vector<8x32xf32>
    %224 = arith.divf %222, %223 : vector<8x32xf32>
    %225 = arith.mulf %216, %198 : vector<8x32xf32>
    %226 = arith.mulf %210, %218 : vector<8x32xf32>
    %227 = arith.addf %225, %226 : vector<8x32xf32>
    %228 = math.tanh %227 : vector<8x32xf32>
    %229 = arith.mulf %224, %228 : vector<8x32xf32>
    %230 = vector.extract_strided_slice %169 {offsets = [16, 0], sizes = [8, 128], strides = [1, 1]} : vector<32x128xf32> to vector<8x128xf32>
    %231 = arith.truncf %229 : vector<8x32xf32> to vector<8x32xbf16>
    %cst_149 = arith.constant dense<0.000000e+00> : vector<8x128xf32>
    %232 = tpu.matmul %231, %165, %cst_149 {dimension_numbers = #tpu.dot_dimension_numbers<[1], [0], [0], [1], [0, 0, 1, 1], [], []>} : vector<8x32xbf16>, vector<32x128xbf16>, vector<8x128xf32> -> vector<8x128xf32>
    %233 = arith.addf %230, %232 : vector<8x128xf32>
    %234 = vector.extract_strided_slice %233 {offsets = [0, 0], sizes = [8, 32], strides = [1, 1]} : vector<8x128xf32> to vector<8x32xf32>
    %235 = arith.negf %234 : vector<8x32xf32>
    %236 = math.exp %235 : vector<8x32xf32>
    %cst_150 = arith.constant 1.000000e+00 : f32
    %237 = vector.broadcast %cst_150 : f32 to vector<8x32xf32>
    %238 = arith.addf %237, %236 : vector<8x32xf32>
    %239 = arith.divf %237, %238 : vector<8x32xf32>
    %240 = vector.extract_strided_slice %233 {offsets = [0, 32], sizes = [8, 32], strides = [1, 1]} : vector<8x128xf32> to vector<8x32xf32>
    %241 = arith.negf %240 : vector<8x32xf32>
    %242 = math.exp %241 : vector<8x32xf32>
    %cst_151 = arith.constant 1.000000e+00 : f32
    %243 = vector.broadcast %cst_151 : f32 to vector<8x32xf32>
    %244 = arith.addf %243, %242 : vector<8x32xf32>
    %245 = arith.divf %243, %244 : vector<8x32xf32>
    %246 = vector.extract_strided_slice %233 {offsets = [0, 64], sizes = [8, 32], strides = [1, 1]} : vector<8x128xf32> to vector<8x32xf32>
    %247 = math.tanh %246 : vector<8x32xf32>
    %248 = vector.extract_strided_slice %233 {offsets = [0, 96], sizes = [8, 32], strides = [1, 1]} : vector<8x128xf32> to vector<8x32xf32>
    %249 = arith.negf %248 : vector<8x32xf32>
    %250 = math.exp %249 : vector<8x32xf32>
    %cst_152 = arith.constant 1.000000e+00 : f32
    %251 = vector.broadcast %cst_152 : f32 to vector<8x32xf32>
    %252 = arith.addf %251, %250 : vector<8x32xf32>
    %253 = arith.divf %251, %252 : vector<8x32xf32>
    %254 = arith.mulf %245, %227 : vector<8x32xf32>
    %255 = arith.mulf %239, %247 : vector<8x32xf32>
    %256 = arith.addf %254, %255 : vector<8x32xf32>
    %257 = math.tanh %256 : vector<8x32xf32>
    %258 = arith.mulf %253, %257 : vector<8x32xf32>
    %259 = vector.extract_strided_slice %169 {offsets = [24, 0], sizes = [8, 128], strides = [1, 1]} : vector<32x128xf32> to vector<8x128xf32>
    %260 = arith.truncf %258 : vector<8x32xf32> to vector<8x32xbf16>
    %cst_153 = arith.constant dense<0.000000e+00> : vector<8x128xf32>
    %261 = tpu.matmul %260, %165, %cst_153 {dimension_numbers = #tpu.dot_dimension_numbers<[1], [0], [0], [1], [0, 0, 1, 1], [], []>} : vector<8x32xbf16>, vector<32x128xbf16>, vector<8x128xf32> -> vector<8x128xf32>
    %262 = arith.addf %259, %261 : vector<8x128xf32>
    %263 = vector.extract_strided_slice %262 {offsets = [0, 0], sizes = [8, 32], strides = [1, 1]} : vector<8x128xf32> to vector<8x32xf32>
    %264 = arith.negf %263 : vector<8x32xf32>
    %265 = math.exp %264 : vector<8x32xf32>
    %cst_154 = arith.constant 1.000000e+00 : f32
    %266 = vector.broadcast %cst_154 : f32 to vector<8x32xf32>
    %267 = arith.addf %266, %265 : vector<8x32xf32>
    %268 = arith.divf %266, %267 : vector<8x32xf32>
    %269 = vector.extract_strided_slice %262 {offsets = [0, 32], sizes = [8, 32], strides = [1, 1]} : vector<8x128xf32> to vector<8x32xf32>
    %270 = arith.negf %269 : vector<8x32xf32>
    %271 = math.exp %270 : vector<8x32xf32>
    %cst_155 = arith.constant 1.000000e+00 : f32
    %272 = vector.broadcast %cst_155 : f32 to vector<8x32xf32>
    %273 = arith.addf %272, %271 : vector<8x32xf32>
    %274 = arith.divf %272, %273 : vector<8x32xf32>
    %275 = vector.extract_strided_slice %262 {offsets = [0, 64], sizes = [8, 32], strides = [1, 1]} : vector<8x128xf32> to vector<8x32xf32>
    %276 = math.tanh %275 : vector<8x32xf32>
    %277 = vector.extract_strided_slice %262 {offsets = [0, 96], sizes = [8, 32], strides = [1, 1]} : vector<8x128xf32> to vector<8x32xf32>
    %278 = arith.negf %277 : vector<8x32xf32>
    %279 = math.exp %278 : vector<8x32xf32>
    %cst_156 = arith.constant 1.000000e+00 : f32
    %280 = vector.broadcast %cst_156 : f32 to vector<8x32xf32>
    %281 = arith.addf %280, %279 : vector<8x32xf32>
    %282 = arith.divf %280, %281 : vector<8x32xf32>
    %283 = arith.mulf %274, %256 : vector<8x32xf32>
    %284 = arith.mulf %268, %276 : vector<8x32xf32>
    %285 = arith.addf %283, %284 : vector<8x32xf32>
    %286 = math.tanh %285 : vector<8x32xf32>
    %287 = arith.mulf %282, %286 : vector<8x32xf32>
    %288 = arith.truncf %33 : vector<8x32xf32> to vector<8x32xbf16>
    %cst_157 = arith.constant dense<0.000000e+00> : vector<8x32xf32>
    %289 = tpu.matmul %288, %6, %cst_157 {dimension_numbers = #tpu.dot_dimension_numbers<[1], [0], [0], [1], [0, 0, 1, 1], [], []>} : vector<8x32xbf16>, vector<32x32xbf16>, vector<8x32xf32> -> vector<8x32xf32>
    %290 = arith.truncf %287 : vector<8x32xf32> to vector<8x32xbf16>
    %cst_158 = arith.constant dense<0.000000e+00> : vector<8x32xf32>
    %291 = tpu.matmul %290, %7, %cst_158 {dimension_numbers = #tpu.dot_dimension_numbers<[1], [0], [0], [1], [0, 0, 1, 1], [], []>} : vector<8x32xbf16>, vector<32x32xbf16>, vector<8x32xf32> -> vector<8x32xf32>
    %292 = arith.addf %289, %291 : vector<8x32xf32>
    %293 = vector.broadcast %11 : vector<1x32xf32> to vector<8x32xf32>
    %294 = arith.addf %292, %293 : vector<8x32xf32>
    %cst_159 = arith.constant 0.000000e+00 : f32
    %295 = vector.broadcast %cst_159 : f32 to vector<8x32xf32>
    %296 = arith.maximumf %294, %295 : vector<8x32xf32>
    %297 = vector.broadcast %12 : vector<1x32xf32> to vector<8x32xf32>
    %298 = arith.mulf %296, %297 : vector<8x32xf32>
    %cst_160 = arith.constant dense<0.000000e+00> : vector<8xf32>
    %299 = vector.multi_reduction <add>, %298, %cst_160 [1] : vector<8x32xf32> to vector<8xf32>
    %300 = vector.shape_cast %299 : vector<8xf32> to vector<8x1xf32>
    %301 = vector.broadcast %13 : vector<1x1xf32> to vector<8x1xf32>
    %302 = arith.addf %300, %301 : vector<8x1xf32>
    %303 = vector.shape_cast %302 : vector<8x1xf32> to vector<8x1xf32>
    %304 = vector.broadcast %303 : vector<8x1xf32> to vector<8x128xf32>
    %c0_161 = arith.constant 0 : index
    %c0_162 = arith.constant 0 : index
    %305 = vector.load %arg10[%c0_161, %c0_162] : memref<8x128xf32, #tpu.memory_space<vmem>>, vector<8x128xf32>
    tpu.vector_store %arg10[%c0_161, %c0_162], %304 {strides = array<i32>} : memref<8x128xf32, #tpu.memory_space<vmem>>, vector<8x128xf32>,
    return
  }
  func.func @transform_0(%arg0: i32, %arg1: memref<32xi32, #tpu.memory_space<smem>>) -> (i32, i32) {
    %c0_i32 = arith.constant 0 : i32
    %c0_i32_0 = arith.constant 0 : i32
    %c0_i32_1 = arith.constant 0 : i32
    return %c0_i32, %c0_i32_0 : i32, i32
  }
  func.func @transform_1(%arg0: i32, %arg1: memref<32xi32, #tpu.memory_space<smem>>) -> (i32, i32) {
    %c0_i32 = arith.constant 0 : i32
    %c0_i32_0 = arith.constant 0 : i32
    %c0_i32_1 = arith.constant 0 : i32
    return %c0_i32, %c0_i32_0 : i32, i32
  }
  func.func @transform_2(%arg0: i32, %arg1: memref<32xi32, #tpu.memory_space<smem>>) -> (i32, i32) {
    %c0_i32 = arith.constant 0 : i32
    %c0_i32_0 = arith.constant 0 : i32
    %c0_i32_1 = arith.constant 0 : i32
    return %c0_i32, %c0_i32_0 : i32, i32
  }
  func.func @transform_3(%arg0: i32, %arg1: memref<32xi32, #tpu.memory_space<smem>>) -> (i32, i32) {
    %c0_i32 = arith.constant 0 : i32
    %c0_i32_0 = arith.constant 0 : i32
    %c0_i32_1 = arith.constant 0 : i32
    return %c0_i32, %c0_i32_0 : i32, i32
  }
  func.func @transform_4(%arg0: i32, %arg1: memref<32xi32, #tpu.memory_space<smem>>) -> (i32, i32) {
    %c0_i32 = arith.constant 0 : i32
    %c0_i32_0 = arith.constant 0 : i32
    %c0_i32_1 = arith.constant 0 : i32
    return %c0_i32, %c0_i32_0 : i32, i32
  }
  func.func @transform_5(%arg0: i32, %arg1: memref<32xi32, #tpu.memory_space<smem>>) -> (i32, i32) {
    %c0_i32 = arith.constant 0 : i32
    %c0_i32_0 = arith.constant 0 : i32
    %c0_i32_1 = arith.constant 0 : i32
    return %c0_i32, %c0_i32_0 : i32, i32
  }
  func.func @transform_6(%arg0: i32, %arg1: memref<32xi32, #tpu.memory_space<smem>>) -> (i32, i32) {
    %c0_i32 = arith.constant 0 : i32
    %c0_i32_0 = arith.constant 0 : i32
    %c0_i32_1 = arith.constant 0 : i32
    return %c0_i32, %c0_i32_0 : i32, i32
  }
  func.func @transform_7(%arg0: i32, %arg1: memref<32xi32, #tpu.memory_space<smem>>) -> (i32, i32) {
    %c0_i32 = arith.constant 0 : i32
    %c0_i32_0 = arith.constant 0 : i32
    %c0_i32_1 = arith.constant 0 : i32
    return %c0_i32, %c0_i32_0 : i32, i32
  }
  func.func @transform_8(%arg0: i32, %arg1: memref<32xi32, #tpu.memory_space<smem>>) -> (i32, i32) {
    %c0_i32 = arith.constant 0 : i32
    %c0_i32_0 = arith.constant 0 : i32
    %c0_i32_1 = arith.constant 0 : i32
    return %c0_i32, %c0_i32_0 : i32, i32
  }
}

</mosaic_0001>

<bundles_post_ra>
// kernel: tpu_custom_call.1
= control target key start
LH: loop header
LB: loop body
LE: loop exit
PB: predicated region body
PF: predicated region fallthrough
CT: control target
= control target key end

     0   :  { %s1978_s0 = inlined_call_operand.vmem [shape: s32[32], index: 0, kind: input, shape index: {}]   ;;  %s1979_s1 = inlined_call_operand.hbm [shape: bf16[16,16], index: 1, kind: input, shape index: {}]   ;;  %s1980_s2 = inlined_call_operand.vmem [shape: bf16[16,8], index: 2, kind: input, shape index: {}]   ;;  %s1981_s3 = inlined_call_operand.hbm [shape: bf16[8,16], index: 3, kind: input, shape index: {}]   ;;  %s1982_s4 = inlined_call_operand.hbm [shape: bf16[8,64], index: 4, kind: input, shape index: {}]   ;;  %s1983_s5 = inlined_call_operand.vmem [shape: bf16[32,128], index: 5, kind: input, shape index: {}]   ;;  %s1984_s6 = inlined_call_operand.vmem [shape: bf16[32,128], index: 6, kind: input, shape index: {}]   ;;  %s1985_s7 = inlined_call_operand.hbm [shape: bf16[32,128], index: 7, kind: input, shape index: {}]   ;;  %s1986_s8 = inlined_call_operand.vmem [shape: f32[8,128], index: 8, kind: input, shape index: {}]   ;;  %s1987_s9 = inlined_call_operand.hbm [shape: f32[8,128], index: 9, kind: output, shape index: {}]  }
   0x1   :  { %1993 = sst [smem:[#allocation26_spill]] %s1986_s8  ;;  %s14_s11 = sshll.u32 %s1978_s0, 4  ;;  %s15_s11 = int_to_ptr.vmem [resolvable:$true] %s14_s11 }
   0x2   :  { %1994 = sst [smem:[#allocation27_spill]] %s1987_s9  ;;  %s1419_s12 = scalar_lea.vmem %s15_s11, 16 }
   0x3   :  { %p1420_p0 = scmp.ne.s32.totalorder %s15_s11, %s1419_s12  ;;  %p1424_p1 = scmp.lt.s32.totalorder %s15_s11, %s15_s11 }
   0x4   :  { %p1425_p2 = scmp.lt.s32.totalorder %s1419_s12, %s1419_s12 }
   0x6   :  { %p1426_p3 = por %p1425_p2, %p1424_p1 }
   0x8   :  { %p1427_p4 = pnand %p1426_p3, %p1420_p0 }
   0xa   :  { %1430 = shalt.err (!%p1427_p4)  }
   0xb   :  { %s1551_s13 = smov [#allocation5]  }
   0xc   :  { %17 = dma.vmem_to_smem %s15_s11, 16, %s1551_s13, [#allocation4] }
   0xd   :  { %1541 = dma.done.wait [#allocation4], 16 }
   0xe   :  { %1542 = vsyncadd [#allocation4], 4294967280 }
   0xf   :  { %19 = sfence }
  0x10   :  { %20 = vsyncpa [#allocation7], 0 }
  0x11   :  { %21 = vsyncpa [#allocation10], 0 }
  0x12   :  { %22 = vsyncpa [#allocation13], 0 }
  0x13   :  { %23 = vsyncpa [#allocation8], 0  ;;  %s1552_s14 = smov [#allocation9]   ;;  %s1553_s0 = smov [#allocation6]  }
  0x14   :  { %s44_s15 = sshll.u32 %s1552_s14, 4  ;;  %s29_s16 = sshll.u32 %s1553_s0, 4  ;;  %s45_s15 = int_to_ptr.vmem [resolvable:$true] %s44_s15  ;;  %s1617_s16 = int_to_ptr.vmem [resolvable:$true] %s29_s16 }
  0x15   :  { %s1431_s19 = scalar_lea.hbm %s1981_s3, 64 }
  0x16   :  { %p1432_p5 = scmp.ne.s32.totalorder %s1981_s3, %s1431_s19  ;;  %p1435_p6 = scmp.lt.u32.totalorder %s1431_s19, %s1981_s3 }
  0x18   :  { %p1437_p7 = pnand %p1435_p6, %p1432_p5 }
  0x1a   :  { %1440 = shalt.err (!%p1437_p7)
}
  0x1b   :  { %s1441_s24 = scalar_lea.vmem %s45_s15, 64  ;;  %p1446_p9 = scmp.lt.s32.totalorder %s45_s15, %s45_s15 }
  0x1c   :  { %p1442_p8 = scmp.ne.s32.totalorder %s45_s15, %s1441_s24  ;;  %p1447_p10 = scmp.lt.s32.totalorder %s1441_s24, %s1441_s24 }
  0x1e   :  { %p1448_p11 = por %p1447_p10, %p1446_p9 }
  0x20   :  { %p1449_p12 = pnand %p1448_p11, %p1442_p8 }
  0x22   :  { %1452 = shalt.err (!%p1449_p12)
}
  0x23   :  { %47 = dma.hbm_to_vmem [thread:$0]  %s1981_s3, 64, %s45_s15, [#allocation10]  }
  0x24   :  { %s1453_s29 = scalar_lea.hbm %s1979_s1, 128 }
  0x25   :  { %p1454_p13 = scmp.ne.s32.totalorder %s1979_s1, %s1453_s29  ;;  %p1457_p0 = scmp.lt.u32.totalorder %s1453_s29, %s1979_s1 }
  0x27   :  { %p1459_p1 = pnand %p1457_p0, %p1454_p13 }
  0x29   :  { %1462 = shalt.err (!%p1459_p1)
}
  0x2a   :  { %s1463_s13 = scalar_lea.vmem %s1617_s16, 128  ;;  %p1468_p3 = scmp.lt.s32.totalorder %s1617_s16, %s1617_s16 }
  0x2b   :  { %p1464_p2 = scmp.ne.s32.totalorder %s1617_s16, %s1463_s13  ;;  %p1469_p4 = scmp.lt.s32.totalorder %s1463_s13, %s1463_s13 }
  0x2d   :  { %p1470_p5 = por %p1469_p4, %p1468_p3 }
  0x2f   :  { %p1471_p6 = pnand %p1470_p5, %p1464_p2 }
  0x31   :  { %1474 = shalt.err (!%p1471_p6)
}
  0x32   :  { %s1988_s3 = smov 64   ;;  %s1555_s14 = smov 4  }
  0x33   :  { %35 = dma.hbm_to_vmem [thread:$0]  %s1979_s1, 128, %s1617_s16, [#allocation7], %s1988_s3, %s1988_s3, %s1555_s14  }
  0x34   :  { %s1556_s17 = smov [#allocation11]   ;;  %s1557_s19 = smov [#allocation12]  }
  0x35   :  { %s54_s18 = sshll.u32 %s1556_s17, 4  ;;  %s67_s20 = sshll.u32 %s1557_s19, 4  ;;  %s55_s18 = int_to_ptr.vmem [resolvable:$true] %s54_s18  ;;  %s1651_s20 = int_to_ptr.vmem [resolvable:$true] %s67_s20 }
  0x36   :  { %s1475_s23 = scalar_lea.hbm %s1982_s4, 64 }
  0x37   :  { %p1476_p7 = scmp.ne.s32.totalorder %s1982_s4, %s1475_s23  ;;  %p1479_p8 = scmp.lt.u32.totalorder %s1475_s23, %s1982_s4 }
  0x39   :  { %p1481_p9 = pnand %p1479_p8, %p1476_p7 }
  0x3b   :  { %1484 = shalt.err (!%p1481_p9)
}
  0x3c   :  { %s1485_s1 = scalar_lea.vmem %s55_s18, 64  ;;  %p1490_p11 = scmp.lt.s32.totalorder %s55_s18, %s55_s18 }
  0x3d   :  { %p1486_p10 = scmp.ne.s32.totalorder %s55_s18, %s1485_s1  ;;  %p1491_p12 = scmp.lt.s32.totalorder %s1485_s1, %s1485_s1 }
  0x3f   :  { %p1492_p13 = por %p1491_p12, %p1490_p11 }
  0x41   :  { %p1493_p0 = pnand %p1492_p13, %p1486_p10 }
  0x43   :  { %1496 = shalt.err (!%p1493_p0)
}
  0x44   :  { %57 = dma.hbm_to_vmem [thread:$0]  %s1982_s4, 64, %s55_s18, [#allocation10]  }
  0x45   :  { %s1497_s10 = scalar_lea.hbm %s1985_s7, 256 }
  0x46   :  { %p1498_p1 = scmp.ne.s32.totalorder %s1985_s7, %s1497_s10  ;;  %p1501_p2 = scmp.lt.u32.totalorder %s1497_s10, %s1985_s7 }
  0x48   :  { %p1503_p3 = pnand %p1501_p2, %p1498_p1 }
  0x4a   :  { %1506 = shalt.err (!%p1503_p3)
}
  0x4b   :  { %s1507_s0 = scalar_lea.vmem %s1651_s20, 256  ;;  %p1512_p5 = scmp.lt.s32.totalorder %s1651_s20, %s1651_s20 }
  0x4c   :  { %p1508_p4 = scmp.ne.s32.totalorder %s1651_s20, %s1507_s0  ;;  %p1513_p6 = scmp.lt.s32.totalorder %s1507_s0, %s1507_s0 }
  0x4e   :  { %p1514_p7 = por %p1513_p6, %p1512_p5 }
  0x50   :  { %p1515_p8 = pnand %p1514_p7, %p1508_p4 }
  0x52   :  { %1518 = shalt.err (!%p1515_p8)
}
  0x53   :  { %73 = dma.hbm_to_vmem [thread:$0]  %s1985_s7, 256, %s1651_s20, [#allocation13], %s1988_s3, %s1988_s3, %s1555_s14  }
  0x54   :  { %1543 = dma.done.wait [#allocation7], 128  }
  0x55   :  { %1544 = vsyncadd [#allocation7], 4294967168 }
  0x56   :  { %1545 = dma.done.wait [#allocation10], 128  }
  0x57   :  { %1546 = vsyncadd [#allocation10], 4294967168 }
  0x58   :  { %1547 = dma.done.wait [#allocation13], 256  }
  0x59   :  { %1548 = vsyncadd [#allocation13], 4294967040  ;;  %v1558_v0 = vmov 0.0   ;;  %vm1559_vm0 = vmmov 0   ;;  %vm115_vm1 = vcmask 130048   ;;  %v1378_v1 = vld [vmem:[%s1980_s2] sm:$0xff]  }
  0x5a   :  { %1262 = vmatprep.subr.bf16.mxu0 %v1558_v0  ;;  %1264 = vmatprep.mubr.msk.bf16.mxu0 %vm1559_vm0, %v1558_v0  ;;  %v1379_v2 = vld [vmem:[#allocation6] sm:$0xff]   ;;  %vm170_vm2 = vcmask 1043456   ;;  %v93_v3 = vld [vmem:[#allocation11] sm:$0xf]  ;;  %s1560_s18 = smov 96   ;;  %v1703_v6 = vld [vmem:[%s1983_s5] sm:$0xff]  }
  0x5b   :  { %1268 = vmatprep.subr.bf16.mxu1 %v1558_v0  ;;  %1270 = vmatprep.mubr.msk.bf16.mxu1 %vm1559_vm0, %v1558_v0  ;;  %v1163_v4 = vcombine.low %v93_v3, %v93_v3  ;;  %v219_v5 = vsel %vm170_vm2, %v93_v3, 0  ;;  %v1708_v7 = vld [vmem:[%s1983_s5 + $0x8] sm:$0xff]   ;;  %vm166_vm3 = vcmask 64512   ;;  %v1166_v21 = vld [vmem:[%s1986_s8] ss:$0 sm:$0xff]  ;;  %vm329_vm4 = vcmask 261120  }
  0x5c   :  { %1263 = vmatpush3.bf16.msra.mxu0 %v1378_v1  ;;  %325 = vrot.lane.b32.xlu1 %v1708_v7, %s1560_s18  ;;  %v1383_v42 = vld [vmem:[%s1984_s6] sm:$0xff]   ;;  %v1384_v43 = vld [vmem:[%s1984_s6 + $0x8] sm:$0xff]   ;;  %v1561_v44 = vmov 0   ;;  %s1742_s27 = sld [smem:[#allocation5]]  ;;  %s1744_s1 = sld [smem:[#allocation5 + $0x1]]  ;;  %vm476_vm5 = vcmask 253952  }
  0x5d   :  { %1274 = vmatprep.subr.bf16.mxu0 %v1558_v0  ;;  %164 = vrot.lane.b32.xlu0 %v1163_v4, %s1560_s18  ;;  %s1746_s16 = sld [smem:[#allocation5 + $0x2]]  ;;  %s1748_s28 = sld [smem:[#allocation5 + $0x3]]  ;;  %v1172_v45 = vld [vmem:[%s1986_s8 + $0x1] ss:$0 sm:$0xff]  ;;  %v426_v55 = vld [vmem:[#allocation9] sm:$0xf] }
  0x5e   :  { %1377 = vset.pattern.permute.xlu0 %v1561_v44  ;;  %s1750_s29 = sld [smem:[#allocation5 + $0x4]]  ;;  %s1752_s30 = sld [smem:[#allocation5 + $0x5]]  ;;  %v1811_v56 = vld [vmem:[#allocation12] sm:$0xff]   ;;  %v1816_v57 = vld [vmem:[#allocation12 + $0x8] sm:$0xff]  }
  0x5f   :  { %1265 = vmatmul.mubr.msk.bf16.vlgmr.msra.gmra.mrb[0].mxu0 %vm115_vm1, %v1379_v2  ;;  %s1754_s6 = sld [smem:[#allocation5 + $0x6]]  ;;  %s1756_s10 = sld [smem:[#allocation5 + $0x7]] }
  0x60   :  { %1275 = vmatpush3.bf16.msra.mxu0 %v219_v5  ;;  %1276 = vmatprep.mubr.msk.bf16.mxu0 %vm1559_vm0, %v1558_v0  ;;  %s1758_s11 = sld [smem:[#allocation5 + $0x8]]  ;;  %s1760_s12 = sld [smem:[#allocation5 + $0x9]] }
  0x61   :  { %1286 = vmatprep.subr.bf16.mxu0 %v1558_v0  ;;  %323 = vrot.lane.b32.xlu0 %v1703_v6, %s1560_s18  ;;  %s1762_s13 = sld [smem:[#allocation5 + $0xa]]  ;;  %s1764_s15 = sld [smem:[#allocation5 + $0xb]] }
  0x62   :  { %s1766_s0 = sld [smem:[#allocation5 + $0xc]]  ;;  %s1768_s4 = sld [smem:[#allocation5 + $0xd]] }
  0x63   :  { %s1770_s17 = sld [smem:[#allocation5 + $0xe]]  ;;  %s1772_s7 = sld [smem:[#allocation5 + $0xf]] }
  0x64   :  { %s1774_s14 = sld [smem:[#allocation5 + $0x10]]  ;;  %s1776_s18 = sld [smem:[#allocation5 + $0x11]] }
  0x65   :  { %s1778_s2 = sld [smem:[#allocation5 + $0x12]]  ;;  %s1780_s19 = sld [smem:[#allocation5 + $0x13]] }
  0x66   :  { %s1782_s20 = sld [smem:[#allocation5 + $0x14]]  ;;  %s1784_s21 = sld [smem:[#allocation5 + $0x15]] }
  0x67   :  { %s1786_s5 = sld [smem:[#allocation5 + $0x16]]  ;;  %s1791_s24 = sld [smem:[#allocation5 + $0x17]] }
  0x68   :  { %s1793_s25 = sld [smem:[#allocation5 + $0x18]]  ;;  %s1795_s26 = sld [smem:[#allocation5 + $0x19]] }
  0x69   :  { %s1797_s3 = sld [smem:[#allocation5 + $0x1a]]  ;;  %s1799_s9 = sld [smem:[#allocation5 + $0x1b]] }
  0x6a   :  { %s1803_s22 = sld [smem:[#allocation5 + $0x1d]]  ;;  %s1806_s23 = sld [smem:[#allocation5 + $0x1e]] }
  0x6b   :  { %s1808_s8 = sld [smem:[#allocation5 + $0x1f]] }
  0x6d   :  { %1995 = sst [smem:[#allocation20_spill]] %s1786_s5  ;;  %s1801_s5 = sld [smem:[#allocation5 + $0x1c]] }
  0x6f   :  { %1996 = sst [smem:[#allocation21_spill]] %s1799_s9  ;;  %s491_s9 = scalar_lea.vmem [#allocation2], %s1750_s29 }
  0x70   :  { %1998 = sst [smem:[#allocation23_spill]] %s1803_s22  ;;  %s483_s22 = scalar_lea.vmem [#allocation2], %s1746_s16 }
  0x71   :  { %1999 = sst [smem:[#allocation24_spill]] %s1806_s23  ;;  %s479_s23 = scalar_lea.vmem [#allocation2], %s1744_s1 }
  0x72   :  { %2000 = sst [smem:[#allocation25_spill]] %s1808_s8  ;;  %s474_s8 = scalar_lea.vmem [#allocation2], %s1742_s27 }
  0x73   :  { %1997 = sst [smem:[#allocation22_spill]] %s1801_s5  ;;  %s487_s5 = scalar_lea.vmem [#allocation2], %s1748_s28 }
  0x74   :  { %s499_s27 = scalar_lea.vmem [#allocation2], %s1754_s6  ;;  %s503_s1 = scalar_lea.vmem [#allocation2], %s1756_s10 }
  0x75   :  { %s507_s16 = scalar_lea.vmem [#allocation2], %s1758_s11  ;;  %s515_s28 = scalar_lea.vmem [#allocation2], %s1762_s13 }
  0x76   :  { %s519_s29 = scalar_lea.vmem [#allocation2], %s1764_s15  ;;  %s527_s6 = scalar_lea.vmem [#allocation2], %s1768_s4 }
  0x77   :  { %s531_s10 = scalar_lea.vmem [#allocation2], %s1770_s17  ;;  %s535_s11 = scalar_lea.vmem [#allocation2], %s1772_s7 }
  0x78   :  { %s543_s13 = scalar_lea.vmem [#allocation2], %s1776_s18  ;;  %s2001_s15 = sld [smem:[#allocation20_spill]] }
  0x79   :  { %s551_s4 = scalar_lea.vmem [#allocation2], %s1780_s19  ;;  %s555_s17 = scalar_lea.vmem [#allocation2], %s1782_s20 }
  0x7a   :  { %s559_s7 = scalar_lea.vmem [#allocation2], %s1784_s21  ;;  %s567_s18 = scalar_lea.vmem [#allocation2], %s1791_s24 }
  0x7b   :  { %s2003_s19 = sld [smem:[#allocation22_spill]]  ;;  %s2004_s20 = sld [smem:[#allocation23_spill]] }
  0x7c   :  { %s571_s21 = scalar_lea.vmem [#allocation2], %s1793_s25  ;;  %s2005_s24 = sld [smem:[#allocation24_spill]] }
  0x81   :  { %s591_s25 = scalar_lea.vmem [#allocation2], %s2004_s20 }
  0xce   :  { %v326_v16 = vpop.permute.xlu1 %325 }
  0xcf   :  { %v165_v8 = vpop.permute.xlu0 %164 }
  0xd0   :  { %v172_v9 = vsel %vm170_vm2, %v165_v8, 0 }
  0xd1   :  { %1269 = vmatpush3.bf16.msra.mxu1 %v172_v9 }
  0xd2   :  { %1280 = vmatprep.subr.bf16.mxu1 %v1558_v0 }
  0xd3   :  { %v324_v15 = vpop.permute.xlu0 %323 }
  0xd4   :  { %1271 = vmatmul.mubr.msk.bf16.vlgmr.msra.gmra.mrb[0].mxu1 %vm166_vm3, %v1378_v1 }
  0xd5   :  { %1282 = vmatprep.mubr.msk.bf16.mxu1 %vm1559_vm0, %v1558_v0 }
 0x132   :  { %v153_v10 = vpop.f32.mrb[0].mxu0 }
 0x133   :  { %v1266_v11 = vpop.f32.mrb[1].mxu0 }
 0x134   :  { %v156_v12 = vpop.f32.mrb[2].mxu0 }
 0x135   :  { %v160_v13 = vpack.c.bf16 %v156_v12, %v153_v10  ;;  %v1267_v14 = vpop.f32.mrb[3].mxu0 }
 0x137   :  { %1277 = vmatmul.mubr.msk.bf16.vlgmr.msra.gmra.mrb[4].mxu0 %vm166_vm3, %v160_v13 }
 0x138   :  { %1290 = vmatprep.mubr.msk.bf16.mxu0 %vm1559_vm0, %v1558_v0  ;;  %1287 = vmatpush3.bf16.msra.mxu0 %v324_v15 }
 0x139   :  { %1288 = vmatprep.subr.bf16.mxu0 %v1558_v0 }
 0x13c   :  { %1289 = vmatpush3.bf16.msra.mxu0 %v326_v16 }
 0x13d   :  { %1302 = vmatprep.subr.bf16.mxu0 %v1558_v0 }
 0x1a7   :  { %v208_v17 = vpop.f32.mrb[0].mxu1 }
 0x1a8   :  { %v1272_v18 = vpop.f32.mrb[1].mxu1 }
 0x1a9   :  { %v211_v19 = vpop.f32.mrb[2].mxu1 }
 0x1aa   :  { %v1273_v20 = vpop.f32.mrb[3].mxu1 }
 0x20a   :  { %v255_v22 = vpop.f32.mrb[4].mxu0 }
 0x20b   :  { %v256_v23 = vadd.f32 %v255_v22, %v208_v17  ;;  %v1278_v24 = vpop.f32.mrb[5].mxu0 }
 0x20c   :  { %v258_v25 = vpop.f32.mrb[6].mxu0 }
 0x20d   :  { %v266_v26 = vadd.f32 %v1166_v21, %v256_v23  ;;  %v259_v27 = vadd.f32 %v258_v25, %v211_v19  ;;  %v1279_v28 = vpop.f32.mrb[7].mxu0 }
 0x20f   :  { %v267_v29 = vadd.f32 %v1166_v21, %v259_v27  ;;  %v268_v30 = vmax.f32 %v266_v26, 0.0 }
 0x211   :  { %v269_v31 = vmax.f32 %v267_v29, 0.0 }
 0x213   :  { %v270_v32 = vpack.c.bf16 %v269_v31, %v268_v30 }
 0x215   :  { %1281 = vmatpush3.bf16.msra.mxu1 %v270_v32  ;;  %1291 = vmatmul.mubr.msk.bf16.vlgmr.msra.gmra.mrb[8].mxu0 %vm329_vm4, %v270_v32 }
 0x216   :  { %1294 = vmatprep.subr.bf16.mxu1 %v1558_v0  ;;  %1304 = vmatprep.mubr.msk.bf16.mxu0 %vm1559_vm0, %v1558_v0 }
 0x218   :  { %1283 = vmatmul.mubr.msk.bf16.vlgmr.msra.gmra.mrb[4].mxu1 %vm115_vm1, %v1379_v2 }
 0x219   :  { %1295 = vmatpush3.bf16.msra.mxu1 %v1703_v6  ;;  %1298 = vmatprep.mubr.msk.bf16.mxu1 %vm1559_vm0, %v1558_v0 }
 0x21a   :  { %1296 = vmatprep.subr.bf16.mxu1 %v1558_v0 }
 0x21d   :  { %1297 = vmatpush3.bf16.msra.mxu1 %v1708_v7 }
 0x21e   :  { %1308 = vmatprep.subr.bf16.mxu1 %v1383_v42 }
 0x2e8   :  { %v367_v33 = vpop.f32.mrb[8].mxu0 }
 0x2e9   :  { %v1292_v34 = vpop.f32.mrb[9].mxu0 }
 0x2ea   :  { %v370_v35 = vpop.f32.mrb[10].mxu0 }
 0x2eb   :  { %v305_v36 = vpop.f32.mrb[4].mxu1  ;;  %v1293_v37 = vpop.f32.mrb[11].mxu0 }
 0x2ec   :  { %v1284_v38 = vpop.f32.mrb[5].mxu1 }
 0x2ed   :  { %v308_v39 = vpop.f32.mrb[6].mxu1 }
 0x2ee   :  { %v312_v40 = vpack.c.bf16 %v308_v39, %v305_v36  ;;  %v1285_v41 = vpop.f32.mrb[7].mxu1 }
 0x2f0   :  { %1299 = vmatmul.mubr.msk.bf16.vlgmr.msra.gmra.mrb[8].mxu1 %vm329_vm4, %v312_v40 }
 0x2f1   :  { %1309 = vmatpush3.bf16.msra.mxu1 %v1383_v42 }
 0x2f2   :  { %1310 = vmatprep.subr.bf16.mxu1 %v1384_v43 }
 0x2f5   :  { %1311 = vmatpush3.bf16.msra.mxu1 %v1384_v43 }
 0x2f6   :  { %1324 = vmatprep.subr.bf16.mxu1 %v1558_v0 }
 0x3c3   :  { %v413_v46 = vpop.f32.mrb[8].mxu1 }
 0x3c4   :  { %v414_v47 = vadd.f32 %v413_v46, %v367_v33  ;;  %v1300_v48 = vpop.f32.mrb[9].mxu1 }
 0x3c5   :  { %v416_v49 = vpop.f32.mrb[10].mxu1 }
 0x3c6   :  { %v424_v50 = vadd.f32 %v1172_v45, %v414_v47  ;;  %v417_v51 = vadd.f32 %v416_v49, %v370_v35  ;;  %v1301_v52 = vpop.f32.mrb[11].mxu1 }
 0x3c8   :  { %471 = vst.msk [vmem:[#allocation2] sm:$0xff] %vm329_vm4, %v424_v50  ;;  %v425_v53 = vadd.f32 %v1172_v45, %v417_v51 }
 0x3ca   :  { %v427_v54 = vpack.c.bf16 %v425_v53, %v424_v50  ;;  %472 = vst.msk [vmem:[#allocation2 + $0x8] sm:$0xff] %vm329_vm4, %v425_v53 }
 0x3cc   :  { %1303 = vmatpush3.bf16.msra.mxu0 %v427_v54 }
 0x3cd   :  { %1316 = vmatprep.subr.bf16.mxu0 %v1558_v0 }
 0x3cf   :  { %1305 = vmatmul.mubr.msk.bf16.vlgmr.msra.gmra.mrb[12].mxu0 %vm115_vm1, %v426_v55 }
 0x3d0   :  { %1317 = vmatpush3.bf16.msra.mxu0 %v1811_v56  ;;  %1320 = vmatprep.mubr.msk.bf16.mxu0 %vm1559_vm0, %v1558_v0 }
 0x3d1   :  { %v475_v58 = vld [vmem:[%s474_s8] sm:$0x1]  ;;  %1318 = vmatprep.subr.bf16.mxu0 %v1558_v0  ;;  %s495_s8 = scalar_lea.vmem [#allocation2], %s1752_s30  ;;  %s523_s30 = scalar_lea.vmem [#allocation2], %s1766_s0 }
 0x3d2   :  { %v480_v59 = vld [vmem:[%s479_s23] sm:$0x1]  ;;  %477 = vst.msk [vmem:[#allocation3] sm:$0x1] %vm476_vm5, %v475_v58  ;;  %s547_s0 = scalar_lea.vmem [#allocation2], %s1778_s2  ;;  %s2002_s2 = sld [smem:[#allocation21_spill]] }
 0x3d3   :  { %v484_v60 = vld [vmem:[%s483_s22] sm:$0x1]  ;;  %481 = vst.msk [vmem:[#allocation3 + $0x1] sm:$0x1] %vm476_vm5, %v480_v59  ;;  %s579_s22 = scalar_lea.vmem [#allocation2], %s1797_s3  ;;  %s2006_s23 = sld [smem:[#allocation25_spill]] }
 0x3d4   :  { %485 = vst.msk [vmem:[#allocation3 + $0x2] sm:$0x1] %vm476_vm5, %v484_v60  ;;  %v488_v61 = vld [vmem:[%s487_s5] sm:$0x1]  ;;  %1319 = vmatpush3.bf16.msra.mxu0 %v1816_v57  ;;  %s575_s5 = scalar_lea.vmem [#allocation2], %s1795_s26  ;;  %s595_s3 = scalar_lea.vmem [#allocation2], %s2005_s24 }
 0x3d5   :  { %v492_v62 = vld [vmem:[%s491_s9] sm:$0x1]  ;;  %489 = vst.msk [vmem:[#allocation3 + $0x3] sm:$0x1] %vm476_vm5, %v488_v61  ;;  %s511_s9 = scalar_lea.vmem [#allocation2], %s1760_s12  ;;  %1332 = vmatprep.subr.bf16.mxu0 %v1558_v0  ;;  %s539_s12 = scalar_lea.vmem [#allocation2], %s1774_s14 }
 0x3d6   :  { %v496_v63 = vld [vmem:[%s495_s8] sm:$0x1]  ;;  %493 = vst.msk [vmem:[#allocation3 + $0x4] sm:$0x1] %vm476_vm5, %v492_v62  ;;  %s563_s14 = scalar_lea.vmem [#allocation2], %s2001_s15  ;;  %s1563_s15 = smov [#allocation14]  }
 0x3d7   :  { %497 = vst.msk [vmem:[#allocation3 + $0x5] sm:$0x1] %vm476_vm5, %v496_v63  ;;  %v500_v1 = vld [vmem:[%s499_s27] sm:$0x1]  ;;  %1321 = vmatmul.mubr.bf16.vlgmr.msra.gmra.mrb[16].mxu0 %v1561_v44  ;;  %s587_s27 = scalar_lea.vmem [#allocation2], %s2003_s19 }
 0x3d8   :  { %v504_v2 = vld [vmem:[%s503_s1] sm:$0x1]  ;;  %501 = vst.msk [vmem:[#allocation3 + $0x6] sm:$0x1] %vm476_vm5, %v500_v1  ;;  %1333 = vmatpush3.bf16.msra.mxu0 %v1811_v56  ;;  %1336 = vmatprep.mubr.msk.bf16.mxu0 %vm1559_vm0, %v1558_v0  ;;  %s583_s8 = scalar_lea.vmem [#allocation2], %s2002_s2 }
 0x3d9   :  { %v508_v3 = vld [vmem:[%s507_s16] sm:$0x1]  ;;  %505 = vst.msk [vmem:[#allocation3 + $0x7] sm:$0x1] %vm476_vm5, %v504_v2  ;;  %1334 = vmatprep.subr.bf16.mxu0 %v1558_v0  ;;  %s599_s26 = scalar_lea.vmem [#allocation2], %s2006_s23 }
 0x3da   :  { %509 = vst.msk [vmem:[#allocation3 + $0x8] sm:$0x1] %vm476_vm5, %v508_v3  ;;  %v512_v4 = vld [vmem:[%s511_s9] sm:$0x1]  ;;  %s2007_s9 = sld [smem:[#allocation26_spill]] }
 0x3db   :  { %v516_v5 = vld [vmem:[%s515_s28] sm:$0x1]  ;;  %513 = vst.msk [vmem:[#allocation3 + $0x9] sm:$0x1] %vm476_vm5, %v512_v4  ;;  %s2008_s28 = smov 64  }
 0x3dc   :  { %v520_v8 = vld [vmem:[%s519_s29] sm:$0x1]  ;;  %517 = vst.msk [vmem:[#allocation3 + $0xa] sm:$0x1] %vm476_vm5, %v516_v5  ;;  %1335 = vmatpush3.bf16.msra.mxu0 %v1816_v57  ;;  %s1562_s29 = smov 32  }
 0x3dd   :  { %521 = vst.msk [vmem:[#allocation3 + $0xb] sm:$0x1] %vm476_vm5, %v520_v8  ;;  %v524_v9 = vld [vmem:[%s523_s30] sm:$0x1]  ;;  %1348 = vmatprep.subr.bf16.mxu0 %v1558_v0 }
 0x3de   :  { %v528_v10 = vld [vmem:[%s527_s6] sm:$0x1]  ;;  %525 = vst.msk [vmem:[#allocation3 + $0xc] sm:$0x1] %vm476_vm5, %v524_v9 }
 0x3df   :  { %v532_v11 = vld [vmem:[%s531_s10] sm:$0x1]  ;;  %529 = vst.msk [vmem:[#allocation3 + $0xd] sm:$0x1] %vm476_vm5, %v528_v10 }
 0x3e0   :  { %533 = vst.msk [vmem:[#allocation3 + $0xe] sm:$0x1] %vm476_vm5, %v532_v11  ;;  %v536_v12 = vld [vmem:[%s535_s11] sm:$0x1]  ;;  %v602_v29 = vld [vmem:[#allocation3] sm:$0xff] }
 0x3e1   :  { %v540_v13 = vld [vmem:[%s539_s12] sm:$0x1]  ;;  %537 = vst.msk [vmem:[#allocation3 + $0xf] sm:$0x1] %vm476_vm5, %v536_v12  ;;  %v1205_v43 = vld [vmem:[%s2007_s9 + $0x2] ss:$0 sm:$0xff] }
 0x3e2   :  { %v544_v14 = vld [vmem:[%s543_s13] sm:$0x1]  ;;  %541 = vst.msk [vmem:[#allocation3 + $0x10] sm:$0x1] %vm476_vm5, %v540_v13 }
 0x3e3   :  { %545 = vst.msk [vmem:[#allocation3 + $0x11] sm:$0x1] %vm476_vm5, %v544_v14  ;;  %v548_v15 = vld [vmem:[%s547_s0] sm:$0x1]  ;;  %s1117_s0 = sshll.u32 %s1563_s15, 4  ;;  %s1118_s0 = int_to_ptr.vmem [resolvable:$true] %s1117_s0 }
 0x3e4   :  { %v552_v16 = vld [vmem:[%s551_s4] sm:$0x1]  ;;  %549 = vst.msk [vmem:[#allocation3 + $0x12] sm:$0x1] %vm476_vm5, %v548_v15  ;;  %s1519_s4 = scalar_lea.vmem %s1118_s0, 128  ;;  %p1524_p10 = scmp.lt.s32.totalorder %s1118_s0, %s1118_s0 }
 0x3e5   :  { %v556_v17 = vld [vmem:[%s555_s17] sm:$0x1]  ;;  %553 = vst.msk [vmem:[#allocation3 + $0x13] sm:$0x1] %vm476_vm5, %v552_v16  ;;  %p1520_p9 = scmp.ne.s32.totalorder %s1118_s0, %s1519_s4  ;;  %p1525_p11 = scmp.lt.s32.totalorder %s1519_s4, %s1519_s4 }
 0x3e6   :  { %557 = vst.msk [vmem:[#allocation3 + $0x14] sm:$0x1] %vm476_vm5, %v556_v17  ;;  %v560_v18 = vld [vmem:[%s559_s7] sm:$0x1] }
 0x3e7   :  { %v564_v19 = vld [vmem:[%s563_s14] sm:$0x1]  ;;  %561 = vst.msk [vmem:[#allocation3 + $0x15] sm:$0x1] %vm476_vm5, %v560_v18  ;;  %p1526_p12 = por %p1525_p11, %p1524_p10 }
 0x3e8   :  { %v568_v20 = vld [vmem:[%s567_s18] sm:$0x1]  ;;  %565 = vst.msk [vmem:[#allocation3 + $0x16] sm:$0x1] %vm476_vm5, %v564_v19  ;;  %v603_v30 = vld [vmem:[#allocation3 + $0x8] sm:$0xff] }
 0x3e9   :  { %569 = vst.msk [vmem:[#allocation3 + $0x17] sm:$0x1] %vm476_vm5, %v568_v20  ;;  %v572_v21 = vld [vmem:[%s571_s21] sm:$0x1]  ;;  %v614_v31 = vpack.c.bf16 %v603_v30, %v602_v29  ;;  %p1527_p13 = pnand %p1526_p12, %p1520_p9 }
 0x3ea   :  { %v576_v22 = vld [vmem:[%s575_s5] sm:$0x1]  ;;  %573 = vst.msk [vmem:[#allocation3 + $0x18] sm:$0x1] %vm476_vm5, %v572_v21 }
 0x3eb   :  { %v580_v23 = vld [vmem:[%s579_s22] sm:$0x1]  ;;  %577 = vst.msk [vmem:[#allocation3 + $0x19] sm:$0x1] %vm476_vm5, %v576_v22  ;;  %1312 = vmatprep.mubr.msk.bf16.mxu1 %vm329_vm4, %v614_v31 }
 0x3ec   :  { %581 = vst.msk [vmem:[#allocation3 + $0x1a] sm:$0x1] %vm476_vm5, %v580_v23  ;;  %v584_v24 = vld [vmem:[%s583_s8] sm:$0x1] }
 0x3ed   :  { %v588_v25 = vld [vmem:[%s587_s27] sm:$0x1]  ;;  %585 = vst.msk [vmem:[#allocation3 + $0x1b] sm:$0x1] %vm476_vm5, %v584_v24 }
 0x3ee   :  { %v592_v26 = vld [vmem:[%s591_s25] sm:$0x1]  ;;  %589 = vst.msk [vmem:[#allocation3 + $0x1c] sm:$0x1] %vm476_vm5, %v588_v25 }
 0x3ef   :  { %593 = vst.msk [vmem:[#allocation3 + $0x1d] sm:$0x1] %vm476_vm5, %v592_v26  ;;  %v596_v27 = vld [vmem:[%s595_s3] sm:$0x1] }
 0x3f0   :  { %v600_v28 = vld [vmem:[%s599_s26] sm:$0x1]  ;;  %597 = vst.msk [vmem:[#allocation3 + $0x1e] sm:$0x1] %vm476_vm5, %v596_v27 }
 0x3f1   :  { %601 = vst.msk [vmem:[#allocation3 + $0x1f] sm:$0x1] %vm476_vm5, %v600_v28  ;;  %v604_v32 = vld [vmem:[#allocation3 + $0x10] sm:$0xff] }
 0x3f8   :  { %v605_v33 = vld [vmem:[#allocation3 + $0x18] sm:$0xff] }
 0x3f9   :  { %v615_v34 = vpack.c.bf16 %v605_v33, %v604_v32 }
 0x3fb   :  { %1313 = vmatmul.mubr.msk.bf16.vlgmr.msra.gmra.mrb[12].mxu1 %vm329_vm4, %v615_v34 }
 0x3fc   :  { %1325 = vmatpush3.bf16.msra.mxu1 %v1811_v56  ;;  %1328 = vmatprep.mubr.msk.bf16.mxu1 %vm1559_vm0, %v1558_v0 }
 0x3fd   :  { %1326 = vmatprep.subr.bf16.mxu1 %v1558_v0 }
 0x400   :  { %1327 = vmatpush3.bf16.msra.mxu1 %v1816_v57 }
 0x401   :  { %1340 = vmatprep.subr.bf16.mxu1 %v1558_v0 }
 0x4a2   :  { %v1902_v35 = vpop.f32.mrb[12].mxu0 }
 0x4a3   :  { %v1306_v36 = vpop.f32.mrb[13].mxu0 }
 0x4a4   :  { %v468_v37 = vpop.f32.mrb[14].mxu0 }
 0x4a5   :  { %v1307_v38 = vpop.f32.mrb[15].mxu0 }
 0x4aa   :  { %v736_v39 = vpop.f32.mrb[16].mxu0 }
 0x4ab   :  { %v1322_v40 = vpop.f32.mrb[17].mxu0 }
 0x4ac   :  { %v739_v41 = vpop.f32.mrb[18].mxu0 }
 0x4ad   :  { %v1323_v42 = vpop.f32.mrb[19].mxu0 }
 0x4ce   :  { %v1314_v44 = vpop.f32.mrb[12].mxu1 }
 0x4cf   :  { %v1907_v45 = vadd.f32 %v1314_v44, %v1205_v43  ;;  %v672_v46 = vpop.f32.mrb[13].mxu1 }
 0x4d0   :  { %v673_v47 = vadd.f32 %v1205_v43, %v672_v46  ;;  %v1315_v48 = vpop.f32.mrb[14].mxu1 }
 0x4d1   :  { %v1909_v49 = vadd.f32 %v1315_v48, %v1205_v43  ;;  %v675_v50 = vpop.f32.mrb[15].mxu1 }
 0x4d2   :  { %v676_v51 = vadd.f32 %v1205_v43, %v675_v50  ;;  %v742_v52 = vadd.f32 %v736_v39, %v673_v47 }
 0x4d4   :  { %1387 = vtanh.f32 %v742_v52  ;;  %v1212_v54 = vmul.f32 -1.442695, %v742_v52 }
 0x4d6   :  { %1389 = vpow2.f32 %v1212_v54 }
 0x4de   :  { %v1388_v53 = vpop.eup %1387 }
 0x4df   :  { %752 = vrot.lane.b32.xlu1 %v1388_v53, %s2008_s28 }
 0x4e0   :  { %v1390_v55 = vpop.eup %1389 }
 0x4e1   :  { %v746_v58 = vadd.f32 1.0, %v1390_v55 }
 0x4e3   :  { %1391 = vrcp.f32 %v746_v58 }
 0x4ed   :  { %v1392_v59 = vpop.eup %1391 }
 0x4ee   :  { %v750_v62 = vmul.f32 0.0, %v1392_v59 }
 0x551   :  { %v753_v60 = vpop.permute.xlu1 %752 }
 0x552   :  { %v755_v61 = vmul.f32 %v1392_v59, %v753_v60 }
 0x554   :  { %757 = vrot.lane.b32.xlu0 %v755_v61, %s1562_s29 }
 0x5c6   :  { %v758_v63 = vpop.permute.xlu0 %757 }
 0x5c7   :  { %v760_v1 = vadd.f32 %v758_v63, %v750_v62 }
 0x5c9   :  { %1393 = vtanh.f32 %v760_v1 }
 0x5d3   :  { %v1394_v2 = vpop.eup %1393 }
 0x5d4   :  { %763 = vrot.lane.b32.xlu1 %v1394_v2, %s2008_s28 }
 0x646   :  { %v764_v3 = vpop.permute.xlu1 %763 }
 0x647   :  { %v766_v4 = vmul.f32 %v1392_v59, %v764_v3 }
 0x649   :  { %v767_v5 = vpack.c.bf16 %v766_v4, %v766_v4 }
 0x64b   :  { %769 = vrot.lane.b32.xlu0 %v767_v5, %s1562_s29 }
 0x6bd   :  { %v770_v8 = vpop.permute.xlu0 %769 }
 0x6be   :  { %1329 = vmatmul.mubr.msk.bf16.vlgmr.msra.gmra.mrb[16].mxu1 %vm329_vm4, %v770_v8 }
 0x6bf   :  { %1341 = vmatpush3.bf16.msra.mxu1 %v1811_v56  ;;  %1344 = vmatprep.mubr.msk.bf16.mxu1 %vm1559_vm0, %v1558_v0 }
 0x6c0   :  { %1342 = vmatprep.subr.bf16.mxu1 %v1558_v0 }
 0x6c3   :  { %1343 = vmatpush3.bf16.msra.mxu1 %v1816_v57 }
 0x6c4   :  { %1356 = vmatprep.subr.bf16.mxu1 %v1558_v0 }
 0x791   :  { %v808_v9 = vpop.f32.mrb[16].mxu1 }
 0x792   :  { %v814_v10 = vadd.f32 %v808_v9, %v676_v51  ;;  %v1330_v11 = vpop.f32.mrb[17].mxu1 }
 0x793   :  { %v811_v12 = vpop.f32.mrb[18].mxu1 }
 0x794   :  { %1395 = vtanh.f32 %v814_v10  ;;  %v1331_v13 = vpop.f32.mrb[19].mxu1  ;;  %v1214_v15 = vmul.f32 -1.442695, %v814_v10  ;;  %v983_v12 = vpack.c.bf16 %v1902_v35, %v1902_v35  ;;  %v1222_v35 = vld [vmem:[%s2007_s9 + $0x4] ss:$0 sm:$0xff] }
 0x796   :  { %1397 = vpow2.f32 %v1214_v15 }
 0x79e   :  { %v1396_v14 = vpop.eup %1395 }
 0x79f   :  { %824 = vrot.lane.b32.xlu1 %v1396_v14, %s2008_s28 }
 0x7a0   :  { %v1398_v56 = vpop.eup %1397 }
 0x7a1   :  { %v818_v16 = vadd.f32 1.0, %v1398_v56  ;;  %v1221_v56 = vld [vmem:[%s2007_s9 + $0x3] ss:$0 sm:$0xff] }
 0x7a3   :  { %1399 = vrcp.f32 %v818_v16 }
 0x7ad   :  { %v1400_v17 = vpop.eup %1399 }
 0x7ae   :  { %v822_v57 = vmul.f32 %v1400_v17, %v760_v1 }
 0x811   :  { %v825_v18 = vpop.permute.xlu1 %824 }
 0x812   :  { %v827_v19 = vmul.f32 %v1400_v17, %v825_v18 }
 0x814   :  { %829 = vrot.lane.b32.xlu0 %v827_v19, %s1562_s29 }
 0x886   :  { %v830_v20 = vpop.permute.xlu0 %829 }
 0x887   :  { %v832_v21 = vadd.f32 %v830_v20, %v822_v57 }
 0x889   :  { %1401 = vtanh.f32 %v832_v21 }
 0x893   :  { %v1402_v22 = vpop.eup %1401 }
 0x894   :  { %835 = vrot.lane.b32.xlu1 %v1402_v22, %s2008_s28 }
 0x906   :  { %v836_v23 = vpop.permute.xlu1 %835 }
 0x907   :  { %v838_v24 = vmul.f32 %v1400_v17, %v836_v23  ;;  %v1223_v23 = vld [vmem:[%s2007_s9 + $0x5] ss:$0 sm:$0xff] }
 0x909   :  { %v839_v25 = vpack.c.bf16 %v838_v24, %v838_v24 }
 0x90b   :  { %841 = vrot.lane.b32.xlu0 %v839_v25, %s1562_s29 }
 0x97d   :  { %v842_v26 = vpop.permute.xlu0 %841 }
 0x97e   :  { %1337 = vmatmul.mubr.msk.bf16.vlgmr.msra.gmra.mrb[20].mxu0 %vm329_vm4, %v842_v26 }
 0x97f   :  { %1352 = vmatprep.mubr.msk.bf16.mxu0 %vm1559_vm0, %v1558_v0 }
 0xa51   :  { %v880_v27 = vpop.f32.mrb[20].mxu0 }
 0xa52   :  { %v886_v28 = vadd.f32 %v880_v27, %v1907_v45  ;;  %v1338_v29 = vpop.f32.mrb[21].mxu0 }
 0xa53   :  { %v883_v30 = vpop.f32.mrb[22].mxu0 }
 0xa54   :  { %1403 = vtanh.f32 %v886_v28  ;;  %v1339_v31 = vpop.f32.mrb[23].mxu0  ;;  %v1216_v33 = vmul.f32 -1.442695, %v886_v28 }
 0xa56   :  { %1405 = vpow2.f32 %v1216_v33 }
 0xa5e   :  { %v1404_v32 = vpop.eup %1403 }
 0xa5f   :  { %896 = vrot.lane.b32.xlu1 %v1404_v32, %s2008_s28 }
 0xa60   :  { %v1406_v34 = vpop.eup %1405 }
 0xa61   :  { %v890_v36 = vadd.f32 1.0, %v1406_v34 }
 0xa63   :  { %1407 = vrcp.f32 %v890_v36 }
 0xa6d   :  { %v1408_v37 = vpop.eup %1407 }
 0xa6e   :  { %v894_v40 = vmul.f32 %v1408_v37, %v832_v21 }
 0xad1   :  { %v897_v38 = vpop.permute.xlu1 %896 }
 0xad2   :  { %v899_v39 = vmul.f32 %v1408_v37, %v897_v38 }
 0xad4   :  { %901 = vrot.lane.b32.xlu0 %v899_v39, %s1562_s29 }
 0xb46   :  { %v902_v41 = vpop.permute.xlu0 %901 }
 0xb47   :  { %v904_v42 = vadd.f32 %v902_v41, %v894_v40 }
 0xb49   :  { %1409 = vtanh.f32 %v904_v42 }
 0xb53   :  { %v1410_v43 = vpop.eup %1409 }
 0xb54   :  { %907 = vrot.lane.b32.xlu1 %v1410_v43, %s2008_s28 }
 0xbc6   :  { %v908_v44 = vpop.permute.xlu1 %907 }
 0xbc7   :  { %v910_v45 = vmul.f32 %v1408_v37, %v908_v44 }
 0xbc9   :  { %v911_v46 = vpack.c.bf16 %v910_v45, %v910_v45 }
 0xbcb   :  { %913 = vrot.lane.b32.xlu0 %v911_v46, %s1562_s29 }
 0xc3d   :  { %v914_v47 = vpop.permute.xlu0 %913 }
 0xc3e   :  { %1345 = vmatmul.mubr.msk.bf16.vlgmr.msra.gmra.mrb[20].mxu1 %vm329_vm4, %v914_v47 }
 0xc3f   :  { %1360 = vmatprep.mubr.msk.bf16.mxu1 %vm1559_vm0, %v1558_v0 }
 0xd11   :  { %v952_v48 = vpop.f32.mrb[20].mxu1 }
 0xd12   :  { %v958_v50 = vadd.f32 %v952_v48, %v1909_v49  ;;  %v1346_v51 = vpop.f32.mrb[21].mxu1 }
 0xd13   :  { %v955_v52 = vpop.f32.mrb[22].mxu1 }
 0xd14   :  { %1411 = vtanh.f32 %v958_v50  ;;  %v1347_v53 = vpop.f32.mrb[23].mxu1  ;;  %v1218_v55 = vmul.f32 -1.442695, %v958_v50 }
 0xd16   :  { %1413 = vpow2.f32 %v1218_v55 }
 0xd1e   :  { %v1412_v54 = vpop.eup %1411 }
 0xd1f   :  { %968 = vrot.lane.b32.xlu1 %v1412_v54, %s2008_s28 }
 0xd20   :  { %v1414_v58 = vpop.eup %1413 }
 0xd21   :  { %v962_v59 = vadd.f32 1.0, %v1414_v58 }
 0xd23   :  { %1415 = vrcp.f32 %v962_v59 }
 0xd2d   :  { %v1416_v60 = vpop.eup %1415 }
 0xd2e   :  { %v966_v49 = vmul.f32 %v1416_v60, %v904_v42 }
 0xd91   :  { %v969_v61 = vpop.permute.xlu1 %968 }
 0xd92   :  { %v971_v62 = vmul.f32 %v1416_v60, %v969_v61 }
 0xd94   :  { %973 = vrot.lane.b32.xlu0 %v971_v62, %s1562_s29 }
 0xd98   :  { %988 = vrot.lane.b32.xlu0 %v1703_v6, %s1562_s29 }
 0xd9c   :  { %990 = vrot.lane.b32.xlu0 %v1708_v7, %s1562_s29 }
 0xe06   :  { %v974_v63 = vpop.permute.xlu0 %973 }
 0xe07   :  { %v976_v1 = vadd.f32 %v974_v63, %v966_v49 }
 0xe09   :  { %1417 = vtanh.f32 %v976_v1 }
 0xe0a   :  { %v989_v2 = vpop.permute.xlu0 %988 }
 0xe0b   :  { %1349 = vmatpush3.bf16.msra.mxu0 %v989_v2 }
 0xe0c   :  { %1350 = vmatprep.subr.bf16.mxu0 %v1558_v0 }
 0xe0e   :  { %v991_v4 = vpop.permute.xlu0 %990 }
 0xe0f   :  { %1351 = vmatpush3.bf16.msra.mxu0 %v991_v4 }
 0xe13   :  { %v1418_v3 = vpop.eup %1417 }
 0xe14   :  { %979 = vrot.lane.b32.xlu1 %v1418_v3, %s2008_s28 }
 0xe18   :  { %1037 = vrot.lane.b32.xlu1 %v1703_v6, %s2008_s28 }
 0xe1c   :  { %1039 = vrot.lane.b32.xlu1 %v1708_v7, %s2008_s28 }
 0xe86   :  { %v980_v5 = vpop.permute.xlu1 %979 }
 0xe87   :  { %v982_v8 = vmul.f32 %v1416_v60, %v980_v5 }
 0xe89   :  { %v984_v9 = vpack.c.bf16 %v982_v8, %v982_v8 }
 0xe8a   :  { %v1038_v10 = vpop.permute.xlu1 %1037 }
 0xe8b   :  { %986 = vrot.lane.b32.xlu0 %v984_v9, %s1562_s29  ;;  %1357 = vmatpush3.bf16.msra.mxu1 %v1038_v10 }
 0xe8c   :  { %1358 = vmatprep.subr.bf16.mxu1 %v1558_v0 }
 0xe8e   :  { %v1040_v11 = vpop.permute.xlu1 %1039 }
 0xe8f   :  { %1359 = vmatpush3.bf16.msra.mxu1 %v1040_v11 }
 0xe92   :  { %1361 = vmatmul.mubr.msk.bf16.vlgmr.msra.gmra.mrb[24].mxu1 %vm329_vm4, %v983_v12 }
 0xefd   :  { %v987_v6 = vpop.permute.xlu0 %986 }
 0xefe   :  { %1353 = vmatmul.mubr.msk.bf16.vlgmr.msra.gmra.mrb[24].mxu0 %vm329_vm4, %v987_v6 }
 0xf65   :  { %v1080_v7 = vpop.f32.mrb[24].mxu1 }
 0xf66   :  { %v1362_v13 = vpop.f32.mrb[25].mxu1 }
 0xf67   :  { %v1083_v14 = vpop.f32.mrb[26].mxu1 }
 0xf68   :  { %v1363_v15 = vpop.f32.mrb[27].mxu1 }
 0xfd1   :  { %v1031_v16 = vpop.f32.mrb[24].mxu0 }
 0xfd2   :  { %v1081_v0 = vadd.f32 %v1080_v7, %v1031_v16  ;;  %v1354_v17 = vpop.f32.mrb[25].mxu0 }
 0xfd3   :  { %v1034_v18 = vpop.f32.mrb[26].mxu0 }
 0xfd4   :  { %v1090_v19 = vadd.f32 %v1221_v56, %v1081_v0  ;;  %v1355_v57 = vpop.f32.mrb[27].mxu0 }
 0xfd6   :  { %v1091_v20 = vmax.f32 %v1090_v19, 0.0 }
 0xfd8   :  { %v1096_v21 = vmul.f32 %v1222_v35, %v1091_v20 }
 0xfda   :  { %v1097_v22 = vsel %vm329_vm4, %v1096_v21, 0.0 }
 0xfdb   :  { %1098 = vadd.xlane.f32.xlu1 %v1097_v22 }
0x1068   :  { %v1099_v24 = vpop.xlane.xlu1 %1098 }
0x1069   :  { %v1104_v25 = vadd.f32 %v1223_v23, %v1099_v24 }
0x106b   :  { %1107 = vperm.xlu0 %1377, %v1104_v25  }
0x10ea   :  { %v1108_v26 = vpop.permute.xlu0 %1107 }
0x10eb   :  { %1110 = vst [vmem:[#allocation14] sm:$0xff] %v1108_v26 }
0x10ec   :  { %1530 = shalt.err (!%p1527_p13)
}
0x10ed   :  { %s2009_s14 = sld [smem:[#allocation27_spill]] }
0x10f3   :  { %s1531_s18 = scalar_lea.hbm %s2009_s14, 128 }
0x10f4   :  { %p1532_p0 = scmp.ne.s32.totalorder %s2009_s14, %s1531_s18  ;;  %p1535_p1 = scmp.lt.u32.totalorder %s1531_s18, %s2009_s14 }
0x10f6   :  { %p1537_p2 = pnand %p1535_p1, %p1532_p0 }
0x10f8   :  { %1540 = shalt.err (!%p1537_p2)
}
0x10f9   :  { %1120 = dma.vmem_to_hbm [thread:$0]  %s1118_s0, 128, %s2009_s14, [#allocation8]  }
0x10fa   :  { %1549 = dma.done.wait [#allocation8], 128  }
0x10fb   :  { %1550 = vsyncadd [#allocation8], 4294967168 }
0x10fc   :  { %1124 = vsyncpa [#allocation7], 1 }
0x10fd   :  { %1125 = vsyncpa [#allocation10], 1 }
0x10fe   :  { %1126 = vsyncpa [#allocation13], 1 }
0x10ff   :  { %1127 = vsyncpa [#allocation8], 1 }

</bundles_post_ra>
